<compile_context>
chip_gen: v7x
topology: tpu7x:2x2x1
jax: 0.10.0
libtpu: 0.0.40
codegen_flags: <defaults>
</compile_context>

<pallas_src>
import jax
import jax.numpy as jnp
from jax.experimental import pallas as pl
from jax.experimental.pallas import tpu as pltpu


def _fast_rnn_kernel(x_ref,      # (T, Bt, I)   time-major input block
                     wih1_ref,   # (I, 4H)
                     b1_ref,     # (1, 4H)      b_ih_l0 + b_hh_l0
                     wf_ref,     # (2H, 8H)     [[whh1 | wih2], [0 | whh2]]
                     b2_ref,     # (1, 4H)      b_ih_l1 + b_hh_l1
                     wfc_ref,    # (1, H)       fc weight as a row vector
                     bfc_ref,    # (1, 1)
                     out_ref):   # (Bt, 1)
    T, Bt, _ = x_ref.shape
    H4 = wih1_ref.shape[1]
    H = H4 // 4
    f32, bf16 = jnp.float32, jnp.bfloat16

    # MXU operands in bf16; all elementwise cell math stays f32.
    wih1 = wih1_ref[...].astype(bf16)
    wf = wf_ref[...].astype(bf16)

    # Hoisted, off-chain: layer-0 input projection for all T steps in one matmul.
    # b1 is folded in here so per-step gate assembly is a single add.
    x_all = x_ref[...].reshape(T * Bt, x_ref.shape[-1]).astype(bf16)
    gates_x = (jnp.dot(x_all, wih1, preferred_element_type=f32)
               + b1_ref[...]).reshape(T, Bt, H4)

    # Hoisted broadcast (JAX does not CSE broadcast_in_dim inside the unrolled loop).
    b2_b = jnp.broadcast_to(b2_ref[...], (Bt, H4))

    def gate_split(gates):
        # 2 full-width EUP ops over the (Bt, 4H) vreg, then static lane slices.
        sig = jax.nn.sigmoid(gates)
        th = jnp.tanh(gates)
        return sig[:, :H], sig[:, H:2 * H], th[:, 2 * H:3 * H], sig[:, 3 * H:]

    def cell(gates, c_prev):
        i, f, g, o = gate_split(gates)
        c = f * c_prev + i * g
        return o * jnp.tanh(c), c

    def cell_zero_state(gates):            # c_prev == 0 -> skip the f*c_prev term
        i, _, g, o = gate_split(gates)
        c = i * g
        return o * jnp.tanh(c), c

    # ---- t = 0 (peeled): zero states -> no whh1 matmul, half-height fused matmul ----
    h1, c1 = cell_zero_state(gates_x[0])
    fused = jnp.dot(h1.astype(bf16), wf[:H, :], preferred_element_type=f32)
    rec1 = fused[:, :H4]                               # h1(0) @ whh1  (for step 1)
    h2, c2 = cell_zero_state(fused[:, H4:] + b2_b)     # h1(0) @ wih2  (h2_prev == 0)

    # ---- t = 1 .. T-1: fully unrolled (T is static & small) ----
    for t in range(1, T):
        h1, c1 = cell(gates_x[t] + rec1, c1)
        lhs = jnp.concatenate([h1, h2], axis=-1).astype(bf16)
        if t + 1 < T:
            fused = jnp.dot(lhs, wf, preferred_element_type=f32)
            rec1 = fused[:, :H4]          # feeds layer-0 at step t+1
            g2 = fused[:, H4:]            # layer-1 gates at step t
        else:
            # Last step: rec1 would be dead -> compute only the layer-1 half.
            g2 = jnp.dot(lhs, wf[:, H4:], preferred_element_type=f32)
        h2, c2 = cell(g2 + b2_b, c2)

    # last_output -> dropout (identity, eval) -> fc (VPU mul + lane reduce) -> sigmoid
    logits = jnp.sum(h2 * wfc_ref[...], axis=-1, keepdims=True) + bfc_ref[...]
    out_ref[...] = jax.nn.sigmoid(logits)


@jax.jit
def fast_rnn_forward(x_btI, params):
    """x_btI: (B, T, I) batch-first like the PyTorch module (batch_first=True)."""
    B, T, I = x_btI.shape
    H = params["whh1"].shape[0]

    # Time-major so the kernel's per-step gate slice is a contiguous static view.
    x_tbi = jnp.transpose(x_btI, (1, 0, 2))            # (T, B, I) -- tiny

    # Block-diagonal fused recurrent weight:
    #   rows [0:H]  = [ whh1 | wih2 ],   rows [H:2H] = [ 0 | whh2 ]
    # so [h1 | h2_prev] @ wf = [ h1@whh1  |  h1@wih2 + h2_prev@whh2 ].
    wih2, whh2 = params["w2"][:H], params["w2"][H:]
    wf = jnp.concatenate(
        [jnp.concatenate([params["whh1"], wih2], axis=1),
         jnp.concatenate([jnp.zeros((H, 4 * H), jnp.float32), whh2], axis=1)],
        axis=0)                                        # (2H, 8H)

    # Batch-tiled "parallel" grid: pipelining + v7x dual-TC for large B.
    B_TILE = B if B <= 256 else 256
    assert B % B_TILE == 0, "TODO(synk): pad batch to a multiple of the tile"
    nb = B // B_TILE

    out = pl.pallas_call(
        _fast_rnn_kernel,
        out_shape=jax.ShapeDtypeStruct((B, 1), jnp.float32),
        grid=(nb,),
        in_specs=[
            pl.BlockSpec((T, B_TILE, I), lambda i: (0, i, 0)),    # x (time-major)
            pl.BlockSpec((I, 4 * H), lambda i: (0, 0)),           # wih1
            pl.BlockSpec((1, 4 * H), lambda i: (0, 0)),           # b1
            pl.BlockSpec((2 * H, 8 * H), lambda i: (0, 0)),       # fused recurrent W
            pl.BlockSpec((1, 4 * H), lambda i: (0, 0)),           # b2
            pl.BlockSpec((1, H), lambda i: (0, 0)),               # fc weight (row)
            pl.BlockSpec((1, 1), lambda i: (0, 0)),               # fc bias
        ],
        out_specs=pl.BlockSpec((B_TILE, 1), lambda i: (i, 0)),
        compiler_params=pltpu.CompilerParams(
            dimension_semantics=("parallel",)),
    )(x_tbi, params["wih1"], params["b1"], wf, params["b2"],
      params["wfc"], params["bfc"])
    return out


def init_params(key, input_size=3, hidden_size=32):
    """Deterministic init mimicking PyTorch's U(-1/sqrt(H), 1/sqrt(H)), pre-packed."""
    H, I = hidden_size, input_size
    bound = 1.0 / jnp.sqrt(jnp.float32(H))
    ks = jax.random.split(key, 10)

    def u(k, shape):
        return jax.random.uniform(k, shape, jnp.float32, -bound, bound)

    # Weights pre-transposed to (in_dim, 4H); biases combined (b_ih + b_hh);
    # layer-1 weights stacked along the contraction dim; fc weight as a row.
    params = {
        "wih1": u(ks[0], (I, 4 * H)),
        "whh1": u(ks[1], (H, 4 * H)),
        "b1":   u(ks[2], (1, 4 * H)) + u(ks[3], (1, 4 * H)),
        "w2":   jnp.concatenate([u(ks[4], (H, 4 * H)),      # w_ih_l1^T
                                 u(ks[5], (H, 4 * H))],     # w_hh_l1^T
                                axis=0),
        "b2":   u(ks[6], (1, 4 * H)) + u(ks[7], (1, 4 * H)),
        "wfc":  u(ks[8], (1, H)),
        "bfc":  u(ks[9], (1, 1)),
    }
    return params


def fast_rnn_reference(x_btI, params):
    """Pure-JAX (f32) reference for correctness checking."""
    B, T, I = x_btI.shape
    H = params["whh1"].shape[0]
    wih2 = params["w2"][:H]
    whh2 = params["w2"][H:]

    def cell(x_t, h, c, wih, whh, b):
        gates = x_t @ wih + h @ whh + b
        i = jax.nn.sigmoid(gates[:, 0 * H:1 * H])
        f = jax.nn.sigmoid(gates[:, 1 * H:2 * H])
        g = jnp.tanh(gates[:, 2 * H:3 * H])
        o = jax.nn.sigmoid(gates[:, 3 * H:4 * H])
        c = f * c + i * g
        h = o * jnp.tanh(c)
        return h, c

    h1 = c1 = h2 = c2 = jnp.zeros((B, H), jnp.float32)
    for t in range(T):
        x_t = x_btI[:, t, :]
        h1, c1 = cell(x_t, h1, c1, params["wih1"], params["whh1"], params["b1"])
        h2, c2 = cell(h1, h2, c2, wih2, whh2, params["b2"])
    return jax.nn.sigmoid(h2 @ params["wfc"].T + params["bfc"])


if __name__ == "__main__":
    key = jax.random.PRNGKey(0)
    k_x, k_p = jax.random.split(key)

    B, T, I, H = 2, 8, 3, 32          # batch, seq, input_size, hidden_size
    x = jax.random.normal(k_x, (B, T, I), jnp.float32)
    params = init_params(k_p, input_size=I, hidden_size=H)

    out = jax.block_until_ready(fast_rnn_forward(x, params))

    ref = fast_rnn_reference(x, params)
    assert out.shape == (B, 1)
    # bf16 MXU operands -> loosened tolerance vs. the f32 reference.
    assert jnp.allclose(out, ref, atol=2e-2, rtol=2e-2), (out, ref)

    print("KERNEL_OK")
</pallas_src>

<mosaic_0001>
module attributes {stable_mosaic.version = 11 : i64} {
  func.func @_fast_rnn_kernel(%arg0: i32, %arg1: memref<8x2x3xf32, #tpu.memory_space<vmem>>, %arg2: memref<3x128xf32, #tpu.memory_space<vmem>>, %arg3: memref<1x128xf32, #tpu.memory_space<vmem>>, %arg4: memref<64x256xf32, #tpu.memory_space<vmem>>, %arg5: memref<1x128xf32, #tpu.memory_space<vmem>>, %arg6: memref<1x32xf32, #tpu.memory_space<vmem>>, %arg7: memref<1x1xf32, #tpu.memory_space<vmem>>, %arg8: memref<2x1xf32, #tpu.memory_space<vmem>>) attributes {dimension_semantics = [#tpu.dimension_semantics<parallel>], iteration_bounds = array<i64: 1>, scalar_prefetch = 0 : i64, scratch_operands = 0 : i64, tpu.core_type = #tpu.core_type<tc>, window_params = [{transform_indices = @transform_0, window_bounds = array<i64: 8, 2, 3>}, {pipeline_mode = #tpu.pipeline_mode<synchronous>, transform_indices = @transform_1, window_bounds = array<i64: 3, 128>}, {pipeline_mode = #tpu.pipeline_mode<synchronous>, transform_indices = @transform_2, window_bounds = array<i64: 1, 128>}, {pipeline_mode = #tpu.pipeline_mode<synchronous>, transform_indices = @transform_3, window_bounds = array<i64: 64, 256>}, {pipeline_mode = #tpu.pipeline_mode<synchronous>, transform_indices = @transform_4, window_bounds = array<i64: 1, 128>}, {pipeline_mode = #tpu.pipeline_mode<synchronous>, transform_indices = @transform_5, window_bounds = array<i64: 1, 32>}, {pipeline_mode = #tpu.pipeline_mode<synchronous>, transform_indices = @transform_6, window_bounds = array<i64: 1, 1>}, {transform_indices = @transform_7, window_bounds = array<i64: 2, 1>}]} {
    %c0 = arith.constant 0 : index
    %c0_0 = arith.constant 0 : index
    %0 = vector.load %arg2[%c0, %c0_0] : memref<3x128xf32, #tpu.memory_space<vmem>>, vector<3x128xf32>
    %1 = arith.truncf %0 : vector<3x128xf32> to vector<3x128xbf16>
    %c0_1 = arith.constant 0 : index
    %c0_2 = arith.constant 0 : index
    %2 = vector.load %arg4[%c0_1, %c0_2] : memref<64x256xf32, #tpu.memory_space<vmem>>, vector<64x256xf32>
    %3 = arith.truncf %2 : vector<64x256xf32> to vector<64x256xbf16>
    %c0_3 = arith.constant 0 : index
    %c0_4 = arith.constant 0 : index
    %c0_5 = arith.constant 0 : index
    %4 = vector.load %arg1[%c0_3, %c0_4, %c0_5] : memref<8x2x3xf32, #tpu.memory_space<vmem>>, vector<8x2x3xf32>
    %5 = vector.shape_cast %4 : vector<8x2x3xf32> to vector<16x3xf32>
    %6 = arith.truncf %5 : vector<16x3xf32> to vector<16x3xbf16>
    %cst = arith.constant dense<0.000000e+00> : vector<16x128xf32>
    %7 = tpu.matmul %6, %1, %cst {dimension_numbers = #tpu.dot_dimension_numbers<[1], [0], [0], [1], [0, 0, 1, 1], [], []>} : vector<16x3xbf16>, vector<3x128xbf16>, vector<16x128xf32> -> vector<16x128xf32>
    %c0_6 = arith.constant 0 : index
    %c0_7 = arith.constant 0 : index
    %8 = vector.load %arg3[%c0_6, %c0_7] : memref<1x128xf32, #tpu.memory_space<vmem>>, vector<1x128xf32>
    %9 = vector.broadcast %8 : vector<1x128xf32> to vector<16x128xf32>
    %10 = arith.addf %7, %9 : vector<16x128xf32>
    %11 = vector.shape_cast %10 : vector<16x128xf32> to vector<8x2x128xf32>
    %c0_8 = arith.constant 0 : index
    %c0_9 = arith.constant 0 : index
    %12 = vector.load %arg5[%c0_8, %c0_9] : memref<1x128xf32, #tpu.memory_space<vmem>>, vector<1x128xf32>
    %13 = vector.shape_cast %12 : vector<1x128xf32> to vector<1x128xf32>
    %14 = vector.broadcast %13 : vector<1x128xf32> to vector<2x128xf32>
    %15 = vector.extract_strided_slice %11 {offsets = [0, 0, 0], sizes = [1, 2, 128], strides = [1, 1, 1]} : vector<8x2x128xf32> to vector<1x2x128xf32>
    %16 = vector.shape_cast %15 : vector<1x2x128xf32> to vector<2x128xf32>
    %17 = arith.negf %16 : vector<2x128xf32>
    %18 = math.exp %17 : vector<2x128xf32>
    %cst_10 = arith.constant 1.000000e+00 : f32
    %19 = vector.broadcast %cst_10 : f32 to vector<2x128xf32>
    %20 = arith.addf %19, %18 : vector<2x128xf32>
    %21 = arith.divf %19, %20 : vector<2x128xf32>
    %22 = math.tanh %16 : vector<2x128xf32>
    %23 = vector.extract_strided_slice %21 {offsets = [0, 0], sizes = [2, 32], strides = [1, 1]} : vector<2x128xf32> to vector<2x32xf32>
    %24 = vector.extract_strided_slice %22 {offsets = [0, 64], sizes = [2, 32], strides = [1, 1]} : vector<2x128xf32> to vector<2x32xf32>
    %25 = vector.extract_strided_slice %21 {offsets = [0, 96], sizes = [2, 32], strides = [1, 1]} : vector<2x128xf32> to vector<2x32xf32>
    %26 = arith.mulf %23, %24 : vector<2x32xf32>
    %27 = math.tanh %26 : vector<2x32xf32>
    %28 = arith.mulf %25, %27 : vector<2x32xf32>
    %29 = arith.truncf %28 : vector<2x32xf32> to vector<2x32xbf16>
    %30 = vector.extract_strided_slice %3 {offsets = [0, 0], sizes = [32, 256], strides = [1, 1]} : vector<64x256xbf16> to vector<32x256xbf16>
    %cst_11 = arith.constant dense<0.000000e+00> : vector<2x256xf32>
    %31 = tpu.matmul %29, %30, %cst_11 {dimension_numbers = #tpu.dot_dimension_numbers<[1], [0], [0], [1], [0, 0, 1, 1], [], []>} : vector<2x32xbf16>, vector<32x256xbf16>, vector<2x256xf32> -> vector<2x256xf32>
    %32 = vector.extract_strided_slice %31 {offsets = [0, 0], sizes = [2, 128], strides = [1, 1]} : vector<2x256xf32> to vector<2x128xf32>
    %33 = vector.extract_strided_slice %31 {offsets = [0, 128], sizes = [2, 128], strides = [1, 1]} : vector<2x256xf32> to vector<2x128xf32>
    %34 = arith.addf %33, %14 : vector<2x128xf32>
    %35 = arith.negf %34 : vector<2x128xf32>
    %36 = math.exp %35 : vector<2x128xf32>
    %cst_12 = arith.constant 1.000000e+00 : f32
    %37 = vector.broadcast %cst_12 : f32 to vector<2x128xf32>
    %38 = arith.addf %37, %36 : vector<2x128xf32>
    %39 = arith.divf %37, %38 : vector<2x128xf32>
    %40 = math.tanh %34 : vector<2x128xf32>
    %41 = vector.extract_strided_slice %39 {offsets = [0, 0], sizes = [2, 32], strides = [1, 1]} : vector<2x128xf32> to vector<2x32xf32>
    %42 = vector.extract_strided_slice %40 {offsets = [0, 64], sizes = [2, 32], strides = [1, 1]} : vector<2x128xf32> to vector<2x32xf32>
    %43 = vector.extract_strided_slice %39 {offsets = [0, 96], sizes = [2, 32], strides = [1, 1]} : vector<2x128xf32> to vector<2x32xf32>
    %44 = arith.mulf %41, %42 : vector<2x32xf32>
    %45 = math.tanh %44 : vector<2x32xf32>
    %46 = arith.mulf %43, %45 : vector<2x32xf32>
    %47 = vector.extract_strided_slice %11 {offsets = [1, 0, 0], sizes = [1, 2, 128], strides = [1, 1, 1]} : vector<8x2x128xf32> to vector<1x2x128xf32>
    %48 = vector.shape_cast %47 : vector<1x2x128xf32> to vector<2x128xf32>
    %49 = arith.addf %48, %32 : vector<2x128xf32>
    %50 = arith.negf %49 : vector<2x128xf32>
    %51 = math.exp %50 : vector<2x128xf32>
    %cst_13 = arith.constant 1.000000e+00 : f32
    %52 = vector.broadcast %cst_13 : f32 to vector<2x128xf32>
    %53 = arith.addf %52, %51 : vector<2x128xf32>
    %54 = arith.divf %52, %53 : vector<2x128xf32>
    %55 = math.tanh %49 : vector<2x128xf32>
    %56 = vector.extract_strided_slice %54 {offsets = [0, 0], sizes = [2, 32], strides = [1, 1]} : vector<2x128xf32> to vector<2x32xf32>
    %57 = vector.extract_strided_slice %54 {offsets = [0, 32], sizes = [2, 32], strides = [1, 1]} : vector<2x128xf32> to vector<2x32xf32>
    %58 = vector.extract_strided_slice %55 {offsets = [0, 64], sizes = [2, 32], strides = [1, 1]} : vector<2x128xf32> to vector<2x32xf32>
    %59 = vector.extract_strided_slice %54 {offsets = [0, 96], sizes = [2, 32], strides = [1, 1]} : vector<2x128xf32> to vector<2x32xf32>
    %60 = arith.mulf %57, %26 : vector<2x32xf32>
    %61 = arith.mulf %56, %58 : vector<2x32xf32>
    %62 = arith.addf %60, %61 : vector<2x32xf32>
    %63 = math.tanh %62 : vector<2x32xf32>
    %64 = arith.mulf %59, %63 : vector<2x32xf32>
    %65 = tpu.concatenate %64, %46 in 1 : vector<2x32xf32>, vector<2x32xf32> -> vector<2x64xf32>
    %66 = arith.truncf %65 : vector<2x64xf32> to vector<2x64xbf16>
    %cst_14 = arith.constant dense<0.000000e+00> : vector<2x256xf32>
    %67 = tpu.matmul %66, %3, %cst_14 {dimension_numbers = #tpu.dot_dimension_numbers<[1], [0], [0], [1], [0, 0, 1, 1], [], []>} : vector<2x64xbf16>, vector<64x256xbf16>, vector<2x256xf32> -> vector<2x256xf32>
    %68 = vector.extract_strided_slice %67 {offsets = [0, 0], sizes = [2, 128], strides = [1, 1]} : vector<2x256xf32> to vector<2x128xf32>
    %69 = vector.extract_strided_slice %67 {offsets = [0, 128], sizes = [2, 128], strides = [1, 1]} : vector<2x256xf32> to vector<2x128xf32>
    %70 = arith.addf %69, %14 : vector<2x128xf32>
    %71 = arith.negf %70 : vector<2x128xf32>
    %72 = math.exp %71 : vector<2x128xf32>
    %cst_15 = arith.constant 1.000000e+00 : f32
    %73 = vector.broadcast %cst_15 : f32 to vector<2x128xf32>
    %74 = arith.addf %73, %72 : vector<2x128xf32>
    %75 = arith.divf %73, %74 : vector<2x128xf32>
    %76 = math.tanh %70 : vector<2x128xf32>
    %77 = vector.extract_strided_slice %75 {offsets = [0, 0], sizes = [2, 32], strides = [1, 1]} : vector<2x128xf32> to vector<2x32xf32>
    %78 = vector.extract_strided_slice %75 {offsets = [0, 32], sizes = [2, 32], strides = [1, 1]} : vector<2x128xf32> to vector<2x32xf32>
    %79 = vector.extract_strided_slice %76 {offsets = [0, 64], sizes = [2, 32], strides = [1, 1]} : vector<2x128xf32> to vector<2x32xf32>
    %80 = vector.extract_strided_slice %75 {offsets = [0, 96], sizes = [2, 32], strides = [1, 1]} : vector<2x128xf32> to vector<2x32xf32>
    %81 = arith.mulf %78, %44 : vector<2x32xf32>
    %82 = arith.mulf %77, %79 : vector<2x32xf32>
    %83 = arith.addf %81, %82 : vector<2x32xf32>
    %84 = math.tanh %83 : vector<2x32xf32>
    %85 = arith.mulf %80, %84 : vector<2x32xf32>
    %86 = vector.extract_strided_slice %11 {offsets = [2, 0, 0], sizes = [1, 2, 128], strides = [1, 1, 1]} : vector<8x2x128xf32> to vector<1x2x128xf32>
    %87 = vector.shape_cast %86 : vector<1x2x128xf32> to vector<2x128xf32>
    %88 = arith.addf %87, %68 : vector<2x128xf32>
    %89 = arith.negf %88 : vector<2x128xf32>
    %90 = math.exp %89 : vector<2x128xf32>
    %cst_16 = arith.constant 1.000000e+00 : f32
    %91 = vector.broadcast %cst_16 : f32 to vector<2x128xf32>
    %92 = arith.addf %91, %90 : vector<2x128xf32>
    %93 = arith.divf %91, %92 : vector<2x128xf32>
    %94 = math.tanh %88 : vector<2x128xf32>
    %95 = vector.extract_strided_slice %93 {offsets = [0, 0], sizes = [2, 32], strides = [1, 1]} : vector<2x128xf32> to vector<2x32xf32>
    %96 = vector.extract_strided_slice %93 {offsets = [0, 32], sizes = [2, 32], strides = [1, 1]} : vector<2x128xf32> to vector<2x32xf32>
    %97 = vector.extract_strided_slice %94 {offsets = [0, 64], sizes = [2, 32], strides = [1, 1]} : vector<2x128xf32> to vector<2x32xf32>
    %98 = vector.extract_strided_slice %93 {offsets = [0, 96], sizes = [2, 32], strides = [1, 1]} : vector<2x128xf32> to vector<2x32xf32>
    %99 = arith.mulf %96, %62 : vector<2x32xf32>
    %100 = arith.mulf %95, %97 : vector<2x32xf32>
    %101 = arith.addf %99, %100 : vector<2x32xf32>
    %102 = math.tanh %101 : vector<2x32xf32>
    %103 = arith.mulf %98, %102 : vector<2x32xf32>
    %104 = tpu.concatenate %103, %85 in 1 : vector<2x32xf32>, vector<2x32xf32> -> vector<2x64xf32>
    %105 = arith.truncf %104 : vector<2x64xf32> to vector<2x64xbf16>
    %cst_17 = arith.constant dense<0.000000e+00> : vector<2x256xf32>
    %106 = tpu.matmul %105, %3, %cst_17 {dimension_numbers = #tpu.dot_dimension_numbers<[1], [0], [0], [1], [0, 0, 1, 1], [], []>} : vector<2x64xbf16>, vector<64x256xbf16>, vector<2x256xf32> -> vector<2x256xf32>
    %107 = vector.extract_strided_slice %106 {offsets = [0, 0], sizes = [2, 128], strides = [1, 1]} : vector<2x256xf32> to vector<2x128xf32>
    %108 = vector.extract_strided_slice %106 {offsets = [0, 128], sizes = [2, 128], strides = [1, 1]} : vector<2x256xf32> to vector<2x128xf32>
    %109 = arith.addf %108, %14 : vector<2x128xf32>
    %110 = arith.negf %109 : vector<2x128xf32>
    %111 = math.exp %110 : vector<2x128xf32>
    %cst_18 = arith.constant 1.000000e+00 : f32
    %112 = vector.broadcast %cst_18 : f32 to vector<2x128xf32>
    %113 = arith.addf %112, %111 : vector<2x128xf32>
    %114 = arith.divf %112, %113 : vector<2x128xf32>
    %115 = math.tanh %109 : vector<2x128xf32>
    %116 = vector.extract_strided_slice %114 {offsets = [0, 0], sizes = [2, 32], strides = [1, 1]} : vector<2x128xf32> to vector<2x32xf32>
    %117 = vector.extract_strided_slice %114 {offsets = [0, 32], sizes = [2, 32], strides = [1, 1]} : vector<2x128xf32> to vector<2x32xf32>
    %118 = vector.extract_strided_slice %115 {offsets = [0, 64], sizes = [2, 32], strides = [1, 1]} : vector<2x128xf32> to vector<2x32xf32>
    %119 = vector.extract_strided_slice %114 {offsets = [0, 96], sizes = [2, 32], strides = [1, 1]} : vector<2x128xf32> to vector<2x32xf32>
    %120 = arith.mulf %117, %83 : vector<2x32xf32>
    %121 = arith.mulf %116, %118 : vector<2x32xf32>
    %122 = arith.addf %120, %121 : vector<2x32xf32>
    %123 = math.tanh %122 : vector<2x32xf32>
    %124 = arith.mulf %119, %123 : vector<2x32xf32>
    %125 = vector.extract_strided_slice %11 {offsets = [3, 0, 0], sizes = [1, 2, 128], strides = [1, 1, 1]} : vector<8x2x128xf32> to vector<1x2x128xf32>
    %126 = vector.shape_cast %125 : vector<1x2x128xf32> to vector<2x128xf32>
    %127 = arith.addf %126, %107 : vector<2x128xf32>
    %128 = arith.negf %127 : vector<2x128xf32>
    %129 = math.exp %128 : vector<2x128xf32>
    %cst_19 = arith.constant 1.000000e+00 : f32
    %130 = vector.broadcast %cst_19 : f32 to vector<2x128xf32>
    %131 = arith.addf %130, %129 : vector<2x128xf32>
    %132 = arith.divf %130, %131 : vector<2x128xf32>
    %133 = math.tanh %127 : vector<2x128xf32>
    %134 = vector.extract_strided_slice %132 {offsets = [0, 0], sizes = [2, 32], strides = [1, 1]} : vector<2x128xf32> to vector<2x32xf32>
    %135 = vector.extract_strided_slice %132 {offsets = [0, 32], sizes = [2, 32], strides = [1, 1]} : vector<2x128xf32> to vector<2x32xf32>
    %136 = vector.extract_strided_slice %133 {offsets = [0, 64], sizes = [2, 32], strides = [1, 1]} : vector<2x128xf32> to vector<2x32xf32>
    %137 = vector.extract_strided_slice %132 {offsets = [0, 96], sizes = [2, 32], strides = [1, 1]} : vector<2x128xf32> to vector<2x32xf32>
    %138 = arith.mulf %135, %101 : vector<2x32xf32>
    %139 = arith.mulf %134, %136 : vector<2x32xf32>
    %140 = arith.addf %138, %139 : vector<2x32xf32>
    %141 = math.tanh %140 : vector<2x32xf32>
    %142 = arith.mulf %137, %141 : vector<2x32xf32>
    %143 = tpu.concatenate %142, %124 in 1 : vector<2x32xf32>, vector<2x32xf32> -> vector<2x64xf32>
    %144 = arith.truncf %143 : vector<2x64xf32> to vector<2x64xbf16>
    %cst_20 = arith.constant dense<0.000000e+00> : vector<2x256xf32>
    %145 = tpu.matmul %144, %3, %cst_20 {dimension_numbers = #tpu.dot_dimension_numbers<[1], [0], [0], [1], [0, 0, 1, 1], [], []>} : vector<2x64xbf16>, vector<64x256xbf16>, vector<2x256xf32> -> vector<2x256xf32>
    %146 = vector.extract_strided_slice %145 {offsets = [0, 0], sizes = [2, 128], strides = [1, 1]} : vector<2x256xf32> to vector<2x128xf32>
    %147 = vector.extract_strided_slice %145 {offsets = [0, 128], sizes = [2, 128], strides = [1, 1]} : vector<2x256xf32> to vector<2x128xf32>
    %148 = arith.addf %147, %14 : vector<2x128xf32>
    %149 = arith.negf %148 : vector<2x128xf32>
    %150 = math.exp %149 : vector<2x128xf32>
    %cst_21 = arith.constant 1.000000e+00 : f32
    %151 = vector.broadcast %cst_21 : f32 to vector<2x128xf32>
    %152 = arith.addf %151, %150 : vector<2x128xf32>
    %153 = arith.divf %151, %152 : vector<2x128xf32>
    %154 = math.tanh %148 : vector<2x128xf32>
    %155 = vector.extract_strided_slice %153 {offsets = [0, 0], sizes = [2, 32], strides = [1, 1]} : vector<2x128xf32> to vector<2x32xf32>
    %156 = vector.extract_strided_slice %153 {offsets = [0, 32], sizes = [2, 32], strides = [1, 1]} : vector<2x128xf32> to vector<2x32xf32>
    %157 = vector.extract_strided_slice %154 {offsets = [0, 64], sizes = [2, 32], strides = [1, 1]} : vector<2x128xf32> to vector<2x32xf32>
    %158 = vector.extract_strided_slice %153 {offsets = [0, 96], sizes = [2, 32], strides = [1, 1]} : vector<2x128xf32> to vector<2x32xf32>
    %159 = arith.mulf %156, %122 : vector<2x32xf32>
    %160 = arith.mulf %155, %157 : vector<2x32xf32>
    %161 = arith.addf %159, %160 : vector<2x32xf32>
    %162 = math.tanh %161 : vector<2x32xf32>
    %163 = arith.mulf %158, %162 : vector<2x32xf32>
    %164 = vector.extract_strided_slice %11 {offsets = [4, 0, 0], sizes = [1, 2, 128], strides = [1, 1, 1]} : vector<8x2x128xf32> to vector<1x2x128xf32>
    %165 = vector.shape_cast %164 : vector<1x2x128xf32> to vector<2x128xf32>
    %166 = arith.addf %165, %146 : vector<2x128xf32>
    %167 = arith.negf %166 : vector<2x128xf32>
    %168 = math.exp %167 : vector<2x128xf32>
    %cst_22 = arith.constant 1.000000e+00 : f32
    %169 = vector.broadcast %cst_22 : f32 to vector<2x128xf32>
    %170 = arith.addf %169, %168 : vector<2x128xf32>
    %171 = arith.divf %169, %170 : vector<2x128xf32>
    %172 = math.tanh %166 : vector<2x128xf32>
    %173 = vector.extract_strided_slice %171 {offsets = [0, 0], sizes = [2, 32], strides = [1, 1]} : vector<2x128xf32> to vector<2x32xf32>
    %174 = vector.extract_strided_slice %171 {offsets = [0, 32], sizes = [2, 32], strides = [1, 1]} : vector<2x128xf32> to vector<2x32xf32>
    %175 = vector.extract_strided_slice %172 {offsets = [0, 64], sizes = [2, 32], strides = [1, 1]} : vector<2x128xf32> to vector<2x32xf32>
    %176 = vector.extract_strided_slice %171 {offsets = [0, 96], sizes = [2, 32], strides = [1, 1]} : vector<2x128xf32> to vector<2x32xf32>
    %177 = arith.mulf %174, %140 : vector<2x32xf32>
    %178 = arith.mulf %173, %175 : vector<2x32xf32>
    %179 = arith.addf %177, %178 : vector<2x32xf32>
    %180 = math.tanh %179 : vector<2x32xf32>
    %181 = arith.mulf %176, %180 : vector<2x32xf32>
    %182 = tpu.concatenate %181, %163 in 1 : vector<2x32xf32>, vector<2x32xf32> -> vector<2x64xf32>
    %183 = arith.truncf %182 : vector<2x64xf32> to vector<2x64xbf16>
    %cst_23 = arith.constant dense<0.000000e+00> : vector<2x256xf32>
    %184 = tpu.matmul %183, %3, %cst_23 {dimension_numbers = #tpu.dot_dimension_numbers<[1], [0], [0], [1], [0, 0, 1, 1], [], []>} : vector<2x64xbf16>, vector<64x256xbf16>, vector<2x256xf32> -> vector<2x256xf32>
    %185 = vector.extract_strided_slice %184 {offsets = [0, 0], sizes = [2, 128], strides = [1, 1]} : vector<2x256xf32> to vector<2x128xf32>
    %186 = vector.extract_strided_slice %184 {offsets = [0, 128], sizes = [2, 128], strides = [1, 1]} : vector<2x256xf32> to vector<2x128xf32>
    %187 = arith.addf %186, %14 : vector<2x128xf32>
    %188 = arith.negf %187 : vector<2x128xf32>
    %189 = math.exp %188 : vector<2x128xf32>
    %cst_24 = arith.constant 1.000000e+00 : f32
    %190 = vector.broadcast %cst_24 : f32 to vector<2x128xf32>
    %191 = arith.addf %190, %189 : vector<2x128xf32>
    %192 = arith.divf %190, %191 : vector<2x128xf32>
    %193 = math.tanh %187 : vector<2x128xf32>
    %194 = vector.extract_strided_slice %192 {offsets = [0, 0], sizes = [2, 32], strides = [1, 1]} : vector<2x128xf32> to vector<2x32xf32>
    %195 = vector.extract_strided_slice %192 {offsets = [0, 32], sizes = [2, 32], strides = [1, 1]} : vector<2x128xf32> to vector<2x32xf32>
    %196 = vector.extract_strided_slice %193 {offsets = [0, 64], sizes = [2, 32], strides = [1, 1]} : vector<2x128xf32> to vector<2x32xf32>
    %197 = vector.extract_strided_slice %192 {offsets = [0, 96], sizes = [2, 32], strides = [1, 1]} : vector<2x128xf32> to vector<2x32xf32>
    %198 = arith.mulf %195, %161 : vector<2x32xf32>
    %199 = arith.mulf %194, %196 : vector<2x32xf32>
    %200 = arith.addf %198, %199 : vector<2x32xf32>
    %201 = math.tanh %200 : vector<2x32xf32>
    %202 = arith.mulf %197, %201 : vector<2x32xf32>
    %203 = vector.extract_strided_slice %11 {offsets = [5, 0, 0], sizes = [1, 2, 128], strides = [1, 1, 1]} : vector<8x2x128xf32> to vector<1x2x128xf32>
    %204 = vector.shape_cast %203 : vector<1x2x128xf32> to vector<2x128xf32>
    %205 = arith.addf %204, %185 : vector<2x128xf32>
    %206 = arith.negf %205 : vector<2x128xf32>
    %207 = math.exp %206 : vector<2x128xf32>
    %cst_25 = arith.constant 1.000000e+00 : f32
    %208 = vector.broadcast %cst_25 : f32 to vector<2x128xf32>
    %209 = arith.addf %208, %207 : vector<2x128xf32>
    %210 = arith.divf %208, %209 : vector<2x128xf32>
    %211 = math.tanh %205 : vector<2x128xf32>
    %212 = vector.extract_strided_slice %210 {offsets = [0, 0], sizes = [2, 32], strides = [1, 1]} : vector<2x128xf32> to vector<2x32xf32>
    %213 = vector.extract_strided_slice %210 {offsets = [0, 32], sizes = [2, 32], strides = [1, 1]} : vector<2x128xf32> to vector<2x32xf32>
    %214 = vector.extract_strided_slice %211 {offsets = [0, 64], sizes = [2, 32], strides = [1, 1]} : vector<2x128xf32> to vector<2x32xf32>
    %215 = vector.extract_strided_slice %210 {offsets = [0, 96], sizes = [2, 32], strides = [1, 1]} : vector<2x128xf32> to vector<2x32xf32>
    %216 = arith.mulf %213, %179 : vector<2x32xf32>
    %217 = arith.mulf %212, %214 : vector<2x32xf32>
    %218 = arith.addf %216, %217 : vector<2x32xf32>
    %219 = math.tanh %218 : vector<2x32xf32>
    %220 = arith.mulf %215, %219 : vector<2x32xf32>
    %221 = tpu.concatenate %220, %202 in 1 : vector<2x32xf32>, vector<2x32xf32> -> vector<2x64xf32>
    %222 = arith.truncf %221 : vector<2x64xf32> to vector<2x64xbf16>
    %cst_26 = arith.constant dense<0.000000e+00> : vector<2x256xf32>
    %223 = tpu.matmul %222, %3, %cst_26 {dimension_numbers = #tpu.dot_dimension_numbers<[1], [0], [0], [1], [0, 0, 1, 1], [], []>} : vector<2x64xbf16>, vector<64x256xbf16>, vector<2x256xf32> -> vector<2x256xf32>
    %224 = vector.extract_strided_slice %223 {offsets = [0, 0], sizes = [2, 128], strides = [1, 1]} : vector<2x256xf32> to vector<2x128xf32>
    %225 = vector.extract_strided_slice %223 {offsets = [0, 128], sizes = [2, 128], strides = [1, 1]} : vector<2x256xf32> to vector<2x128xf32>
    %226 = arith.addf %225, %14 : vector<2x128xf32>
    %227 = arith.negf %226 : vector<2x128xf32>
    %228 = math.exp %227 : vector<2x128xf32>
    %cst_27 = arith.constant 1.000000e+00 : f32
    %229 = vector.broadcast %cst_27 : f32 to vector<2x128xf32>
    %230 = arith.addf %229, %228 : vector<2x128xf32>
    %231 = arith.divf %229, %230 : vector<2x128xf32>
    %232 = math.tanh %226 : vector<2x128xf32>
    %233 = vector.extract_strided_slice %231 {offsets = [0, 0], sizes = [2, 32], strides = [1, 1]} : vector<2x128xf32> to vector<2x32xf32>
    %234 = vector.extract_strided_slice %231 {offsets = [0, 32], sizes = [2, 32], strides = [1, 1]} : vector<2x128xf32> to vector<2x32xf32>
    %235 = vector.extract_strided_slice %232 {offsets = [0, 64], sizes = [2, 32], strides = [1, 1]} : vector<2x128xf32> to vector<2x32xf32>
    %236 = vector.extract_strided_slice %231 {offsets = [0, 96], sizes = [2, 32], strides = [1, 1]} : vector<2x128xf32> to vector<2x32xf32>
    %237 = arith.mulf %234, %200 : vector<2x32xf32>
    %238 = arith.mulf %233, %235 : vector<2x32xf32>
    %239 = arith.addf %237, %238 : vector<2x32xf32>
    %240 = math.tanh %239 : vector<2x32xf32>
    %241 = arith.mulf %236, %240 : vector<2x32xf32>
    %242 = vector.extract_strided_slice %11 {offsets = [6, 0, 0], sizes = [1, 2, 128], strides = [1, 1, 1]} : vector<8x2x128xf32> to vector<1x2x128xf32>
    %243 = vector.shape_cast %242 : vector<1x2x128xf32> to vector<2x128xf32>
    %244 = arith.addf %243, %224 : vector<2x128xf32>
    %245 = arith.negf %244 : vector<2x128xf32>
    %246 = math.exp %245 : vector<2x128xf32>
    %cst_28 = arith.constant 1.000000e+00 : f32
    %247 = vector.broadcast %cst_28 : f32 to vector<2x128xf32>
    %248 = arith.addf %247, %246 : vector<2x128xf32>
    %249 = arith.divf %247, %248 : vector<2x128xf32>
    %250 = math.tanh %244 : vector<2x128xf32>
    %251 = vector.extract_strided_slice %249 {offsets = [0, 0], sizes = [2, 32], strides = [1, 1]} : vector<2x128xf32> to vector<2x32xf32>
    %252 = vector.extract_strided_slice %249 {offsets = [0, 32], sizes = [2, 32], strides = [1, 1]} : vector<2x128xf32> to vector<2x32xf32>
    %253 = vector.extract_strided_slice %250 {offsets = [0, 64], sizes = [2, 32], strides = [1, 1]} : vector<2x128xf32> to vector<2x32xf32>
    %254 = vector.extract_strided_slice %249 {offsets = [0, 96], sizes = [2, 32], strides = [1, 1]} : vector<2x128xf32> to vector<2x32xf32>
    %255 = arith.mulf %252, %218 : vector<2x32xf32>
    %256 = arith.mulf %251, %253 : vector<2x32xf32>
    %257 = arith.addf %255, %256 : vector<2x32xf32>
    %258 = math.tanh %257 : vector<2x32xf32>
    %259 = arith.mulf %254, %258 : vector<2x32xf32>
    %260 = tpu.concatenate %259, %241 in 1 : vector<2x32xf32>, vector<2x32xf32> -> vector<2x64xf32>
    %261 = arith.truncf %260 : vector<2x64xf32> to vector<2x64xbf16>
    %cst_29 = arith.constant dense<0.000000e+00> : vector<2x256xf32>
    %262 = tpu.matmul %261, %3, %cst_29 {dimension_numbers = #tpu.dot_dimension_numbers<[1], [0], [0], [1], [0, 0, 1, 1], [], []>} : vector<2x64xbf16>, vector<64x256xbf16>, vector<2x256xf32> -> vector<2x256xf32>
    %263 = vector.extract_strided_slice %262 {offsets = [0, 0], sizes = [2, 128], strides = [1, 1]} : vector<2x256xf32> to vector<2x128xf32>
    %264 = vector.extract_strided_slice %262 {offsets = [0, 128], sizes = [2, 128], strides = [1, 1]} : vector<2x256xf32> to vector<2x128xf32>
    %265 = arith.addf %264, %14 : vector<2x128xf32>
    %266 = arith.negf %265 : vector<2x128xf32>
    %267 = math.exp %266 : vector<2x128xf32>
    %cst_30 = arith.constant 1.000000e+00 : f32
    %268 = vector.broadcast %cst_30 : f32 to vector<2x128xf32>
    %269 = arith.addf %268, %267 : vector<2x128xf32>
    %270 = arith.divf %268, %269 : vector<2x128xf32>
    %271 = math.tanh %265 : vector<2x128xf32>
    %272 = vector.extract_strided_slice %270 {offsets = [0, 0], sizes = [2, 32], strides = [1, 1]} : vector<2x128xf32> to vector<2x32xf32>
    %273 = vector.extract_strided_slice %270 {offsets = [0, 32], sizes = [2, 32], strides = [1, 1]} : vector<2x128xf32> to vector<2x32xf32>
    %274 = vector.extract_strided_slice %271 {offsets = [0, 64], sizes = [2, 32], strides = [1, 1]} : vector<2x128xf32> to vector<2x32xf32>
    %275 = vector.extract_strided_slice %270 {offsets = [0, 96], sizes = [2, 32], strides = [1, 1]} : vector<2x128xf32> to vector<2x32xf32>
    %276 = arith.mulf %273, %239 : vector<2x32xf32>
    %277 = arith.mulf %272, %274 : vector<2x32xf32>
    %278 = arith.addf %276, %277 : vector<2x32xf32>
    %279 = math.tanh %278 : vector<2x32xf32>
    %280 = arith.mulf %275, %279 : vector<2x32xf32>
    %281 = vector.extract_strided_slice %11 {offsets = [7, 0, 0], sizes = [1, 2, 128], strides = [1, 1, 1]} : vector<8x2x128xf32> to vector<1x2x128xf32>
    %282 = vector.shape_cast %281 : vector<1x2x128xf32> to vector<2x128xf32>
    %283 = arith.addf %282, %263 : vector<2x128xf32>
    %284 = arith.negf %283 : vector<2x128xf32>
    %285 = math.exp %284 : vector<2x128xf32>
    %cst_31 = arith.constant 1.000000e+00 : f32
    %286 = vector.broadcast %cst_31 : f32 to vector<2x128xf32>
    %287 = arith.addf %286, %285 : vector<2x128xf32>
    %288 = arith.divf %286, %287 : vector<2x128xf32>
    %289 = math.tanh %283 : vector<2x128xf32>
    %290 = vector.extract_strided_slice %288 {offsets = [0, 0], sizes = [2, 32], strides = [1, 1]} : vector<2x128xf32> to vector<2x32xf32>
    %291 = vector.extract_strided_slice %288 {offsets = [0, 32], sizes = [2, 32], strides = [1, 1]} : vector<2x128xf32> to vector<2x32xf32>
    %292 = vector.extract_strided_slice %289 {offsets = [0, 64], sizes = [2, 32], strides = [1, 1]} : vector<2x128xf32> to vector<2x32xf32>
    %293 = vector.extract_strided_slice %288 {offsets = [0, 96], sizes = [2, 32], strides = [1, 1]} : vector<2x128xf32> to vector<2x32xf32>
    %294 = arith.mulf %291, %257 : vector<2x32xf32>
    %295 = arith.mulf %290, %292 : vector<2x32xf32>
    %296 = arith.addf %294, %295 : vector<2x32xf32>
    %297 = math.tanh %296 : vector<2x32xf32>
    %298 = arith.mulf %293, %297 : vector<2x32xf32>
    %299 = tpu.concatenate %298, %280 in 1 : vector<2x32xf32>, vector<2x32xf32> -> vector<2x64xf32>
    %300 = arith.truncf %299 : vector<2x64xf32> to vector<2x64xbf16>
    %301 = vector.extract_strided_slice %3 {offsets = [0, 128], sizes = [64, 128], strides = [1, 1]} : vector<64x256xbf16> to vector<64x128xbf16>
    %cst_32 = arith.constant dense<0.000000e+00> : vector<2x128xf32>
    %302 = tpu.matmul %300, %301, %cst_32 {dimension_numbers = #tpu.dot_dimension_numbers<[1], [0], [0], [1], [0, 0, 1, 1], [], []>} : vector<2x64xbf16>, vector<64x128xbf16>, vector<2x128xf32> -> vector<2x128xf32>
    %303 = arith.addf %302, %14 : vector<2x128xf32>
    %304 = arith.negf %303 : vector<2x128xf32>
    %305 = math.exp %304 : vector<2x128xf32>
    %cst_33 = arith.constant 1.000000e+00 : f32
    %306 = vector.broadcast %cst_33 : f32 to vector<2x128xf32>
    %307 = arith.addf %306, %305 : vector<2x128xf32>
    %308 = arith.divf %306, %307 : vector<2x128xf32>
    %309 = math.tanh %303 : vector<2x128xf32>
    %310 = vector.extract_strided_slice %308 {offsets = [0, 0], sizes = [2, 32], strides = [1, 1]} : vector<2x128xf32> to vector<2x32xf32>
    %311 = vector.extract_strided_slice %308 {offsets = [0, 32], sizes = [2, 32], strides = [1, 1]} : vector<2x128xf32> to vector<2x32xf32>
    %312 = vector.extract_strided_slice %309 {offsets = [0, 64], sizes = [2, 32], strides = [1, 1]} : vector<2x128xf32> to vector<2x32xf32>
    %313 = vector.extract_strided_slice %308 {offsets = [0, 96], sizes = [2, 32], strides = [1, 1]} : vector<2x128xf32> to vector<2x32xf32>
    %314 = arith.mulf %311, %278 : vector<2x32xf32>
    %315 = arith.mulf %310, %312 : vector<2x32xf32>
    %316 = arith.addf %314, %315 : vector<2x32xf32>
    %317 = math.tanh %316 : vector<2x32xf32>
    %318 = arith.mulf %313, %317 : vector<2x32xf32>
    %c0_34 = arith.constant 0 : index
    %c0_35 = arith.constant 0 : index
    %319 = vector.load %arg6[%c0_34, %c0_35] : memref<1x32xf32, #tpu.memory_space<vmem>>, vector<1x32xf32>
    %320 = vector.broadcast %319 : vector<1x32xf32> to vector<2x32xf32>
    %321 = arith.mulf %318, %320 : vector<2x32xf32>
    %cst_36 = arith.constant dense<0.000000e+00> : vector<2xf32>
    %322 = vector.multi_reduction <add>, %321, %cst_36 [1] : vector<2x32xf32> to vector<2xf32>
    %323 = vector.shape_cast %322 : vector<2xf32> to vector<2x1xf32>
    %c0_37 = arith.constant 0 : index
    %c0_38 = arith.constant 0 : index
    %324 = vector.load %arg7[%c0_37, %c0_38] : memref<1x1xf32, #tpu.memory_space<vmem>>, vector<1x1xf32>
    %325 = vector.broadcast %324 : vector<1x1xf32> to vector<2x1xf32>
    %326 = arith.addf %323, %325 : vector<2x1xf32>
    %327 = arith.negf %326 : vector<2x1xf32>
    %328 = math.exp %327 : vector<2x1xf32>
    %cst_39 = arith.constant 1.000000e+00 : f32
    %329 = vector.broadcast %cst_39 : f32 to vector<2x1xf32>
    %330 = arith.addf %329, %328 : vector<2x1xf32>
    %331 = arith.divf %329, %330 : vector<2x1xf32>
    %c0_40 = arith.constant 0 : index
    %c0_41 = arith.constant 0 : index
    %332 = vector.load %arg8[%c0_40, %c0_41] : memref<2x1xf32, #tpu.memory_space<vmem>>, vector<2x1xf32>
    tpu.vector_store %arg8[%c0_40, %c0_41], %331 {strides = array<i32>} : memref<2x1xf32, #tpu.memory_space<vmem>>, vector<2x1xf32>,
    return
  }
  func.func @transform_0(%arg0: i32) -> (i32, i32, i32) {
    %c0_i32 = arith.constant 0 : i32
    %c0_i32_0 = arith.constant 0 : i32
    %c0_i32_1 = arith.constant 0 : i32
    return %c0_i32, %arg0, %c0_i32_0 : i32, i32, i32
  }
  func.func @transform_1(%arg0: i32) -> (i32, i32) {
    %c0_i32 = arith.constant 0 : i32
    %c0_i32_0 = arith.constant 0 : i32
    %c0_i32_1 = arith.constant 0 : i32
    return %c0_i32, %c0_i32_0 : i32, i32
  }
  func.func @transform_2(%arg0: i32) -> (i32, i32) {
    %c0_i32 = arith.constant 0 : i32
    %c0_i32_0 = arith.constant 0 : i32
    %c0_i32_1 = arith.constant 0 : i32
    return %c0_i32, %c0_i32_0 : i32, i32
  }
  func.func @transform_3(%arg0: i32) -> (i32, i32) {
    %c0_i32 = arith.constant 0 : i32
    %c0_i32_0 = arith.constant 0 : i32
    %c0_i32_1 = arith.constant 0 : i32
    return %c0_i32, %c0_i32_0 : i32, i32
  }
  func.func @transform_4(%arg0: i32) -> (i32, i32) {
    %c0_i32 = arith.constant 0 : i32
    %c0_i32_0 = arith.constant 0 : i32
    %c0_i32_1 = arith.constant 0 : i32
    return %c0_i32, %c0_i32_0 : i32, i32
  }
  func.func @transform_5(%arg0: i32) -> (i32, i32) {
    %c0_i32 = arith.constant 0 : i32
    %c0_i32_0 = arith.constant 0 : i32
    %c0_i32_1 = arith.constant 0 : i32
    return %c0_i32, %c0_i32_0 : i32, i32
  }
  func.func @transform_6(%arg0: i32) -> (i32, i32) {
    %c0_i32 = arith.constant 0 : i32
    %c0_i32_0 = arith.constant 0 : i32
    %c0_i32_1 = arith.constant 0 : i32
    return %c0_i32, %c0_i32_0 : i32, i32
  }
  func.func @transform_7(%arg0: i32) -> (i32, i32) {
    %c0_i32 = arith.constant 0 : i32
    %c0_i32_0 = arith.constant 0 : i32
    return %arg0, %c0_i32 : i32, i32
  }
}

</mosaic_0001>

<bundles_post_ra>
// kernel: fast_rnn_forward.1
= control target key start
LH: loop header
LB: loop body
LE: loop exit
PB: predicated region body
PF: predicated region fallthrough
CT: control target
= control target key end

     0   :  { %vm119_vm0 = vcmask 1040384   ;;  %vm120_vm1 = vcmask 1041408   ;;  %v1321_v0 = vmov 0.0   ;;  %v1322_v2 = vmov 65535   ;;  %s1325_s19 = smov 64   ;;  %s1327_s11 = smov 96   ;;  %s1682_s1 = inlined_call_operand.vmem [shape: f32[3,128], index: 1, kind: input, shape index: {}]   ;;  %s1683_s0 = inlined_call_operand.vmem [shape: f32[8,2,3], index: 0, kind: input, shape index: {}]   ;;  %s1684_s2 = inlined_call_operand.vmem [shape: f32[1,128], index: 2, kind: input, shape index: {}]   ;;  %s1685_s3 = inlined_call_operand.vmem [shape: f32[64,256], index: 3, kind: input, shape index: {}]   ;;  %s1686_s4 = inlined_call_operand.vmem [shape: f32[1,128], index: 4, kind: input, shape index: {}]   ;;  %s1687_s5 = inlined_call_operand.vmem [shape: f32[1,32], index: 5, kind: input, shape index: {}]   ;;  %s1688_s6 = inlined_call_operand.<no memory space> [shape: f32[1,1], index: 6, kind: input, shape index: {}]   ;;  %s1689_s7 = inlined_call_operand.vmem [shape: f32[2,1], index: 7, kind: output, shape index: {}]  }
   0x1   :  { %1163 = vmatprep.subr.bf16.mxu1 %v1321_v0  ;;  %v29_v1 = vld [vmem:[%s1682_s1] sm:$0x7]  ;;  %v121_v3 = vsel %vm119_vm0, 4294967295, %v1322_v2  ;;  %v76_v5 = vlaneseq  ;;  %vm1323_vm2 = vmmov 0   ;;  %v57_v9 = vld [vmem:[%s1683_s0 + $0x4] sm:$0x3] }
   0x2   :  { %v55_v4 = vld [vmem:[%s1683_s0] sm:$0x3]  ;;  %v30_v6 = vpack.c.bf16 %v29_v1, %v29_v1  ;;  %v122_v7 = vsel %vm120_vm1, %v121_v3, 0  ;;  %1165 = vmatprep.mubr.msk.bf16.mxu1 %vm1323_vm2, %v1321_v0  ;;  %v56_v8 = vld [vmem:[%s1683_s0 + $0x2] sm:$0x3]  ;;  %vm115_vm3 = vcmask 23552  }
   0x3   :  { %v58_v10 = vld [vmem:[%s1683_s0 + $0x6] sm:$0x3]  ;;  %v59_v11 = vld [vmem:[%s1683_s0 + $0x8] sm:$0x3]  ;;  %v60_v12 = vld [vmem:[%s1683_s0 + $0xa] sm:$0x3]  ;;  %v71_v19 = vcombine.low %v55_v4, %v56_v8 }
   0x4   :  { %v124_v13 = vand.u32 %v122_v7, %v30_v6  ;;  %v61_v14 = vld [vmem:[%s1683_s0 + $0xc] sm:$0x3]  ;;  %v62_v15 = vld [vmem:[%s1683_s0 + $0xe] sm:$0x3]  ;;  %v1324_v16 = vmov 1983009808   ;;  %v72_v20 = vcombine.low %v57_v9, %v58_v10  ;;  %v88_v22 = vcombine.low %v59_v11, %v60_v12 }
   0x5   :  { %v74_v17 = vunpack.c.l.s4 %v1324_v16  ;;  %v77_v18 = vshrl.u32 %v76_v5, 7  ;;  %v89_v23 = vcombine.low %v61_v14, %v62_v15  ;;  %v1126_v32 = vld [vmem:[%s1684_s2] ss:$0 sm:$0xff]  ;;  %v32_v47 = vld [vmem:[%s1685_s3 + $0x8] sm:$0xff]  ;;  %v34_v48 = vld [vmem:[%s1685_s3 + $0x18] sm:$0xff]  ;;  %v1326_v50 = vmov 0  }
   0x6   :  { %1164 = vmatpush3.bf16.msra.mxu1 %v124_v13  ;;  %v31_v49 = vld [vmem:[%s1685_s3] sm:$0xff]  ;;  %386 = vmatprep.mubr.bf16.mxu0 %v1326_v50  ;;  %v1426_v51 = vpack.c.bf16 %v34_v48, %v32_v47  ;;  %v33_v52 = vld [vmem:[%s1685_s3 + $0x10] sm:$0xff]  ;;  %v36_v53 = vld [vmem:[%s1685_s3 + $0x28] sm:$0xff]  ;;  %s1328_s12 = smov 32   ;;  %vm240_vm4 = vcmask 261120   ;;  %vm350_vm5 = vcmask 523264  }
   0x7   :  { %v75_v21 = vunpack.c.0.s8 %v74_v17  ;;  %v38_v54 = vld [vmem:[%s1685_s3 + $0x38] sm:$0xff]  ;;  %v1437_v55 = vpack.c.bf16 %v33_v52, %v31_v49  ;;  %v35_v57 = vld [vmem:[%s1685_s3 + $0x20] sm:$0xff]  ;;  %v37_v58 = vld [vmem:[%s1685_s3 + $0x30] sm:$0xff]  ;;  %vm1102_vm6 = vcmask 254976   ;;  %vm1120_vm7 = vcmask 1024  }
   0x8   :  { %v1439_v56 = vpack.c.bf16 %v38_v54, %v36_v53  ;;  %244 = vmatprep.subr.bf16.mxu1 %v1426_v51  ;;  %354 = vmatprep.subr.bf16.mxu0 %v1426_v51  ;;  %v1450_v59 = vpack.c.bf16 %v37_v58, %v35_v57  ;;  %v1469_v3 = vld [vmem:[%s1686_s4] ss:$0 sm:$0xff] }
   0x9   :  { %v1399_v24 = vsub.s32 %v75_v21, %v77_v18  ;;  %355 = vmatpush1.bf16.msra.mxu0 %v1437_v55 }
   0xa   :  { %356 = vmatprep.subr.bf16.mxu0 %v1439_v56 }
   0xb   :  { %v79_v25 = vrot.slane %v71_v19, %v1399_v24  ;;  %v86_v26 = vrot.slane %v72_v20, %v1399_v24  ;;  %v96_v27 = vrot.slane %v88_v22, %v1399_v24  ;;  %v103_v28 = vrot.slane %v89_v23, %v1399_v24 }
   0xd   :  { %v87_v29 = vcombine.low %v79_v25, %v86_v26  ;;  %v104_v30 = vcombine.low %v96_v27, %v103_v28  ;;  %357 = vmatpush1.bf16.msra.mxu0 %v1450_v59 }
   0xf   :  { %v107_v31 = vpack.c.bf16 %v104_v30, %v87_v29  ;;  %v40_v30 = vld [vmem:[%s1685_s3 + $0x48] sm:$0xff] }
  0x11   :  { %1166 = vmatmul.mubr.msk.bf16.vlgmr.msra.gmra.mrb[0].mxu1 %vm115_vm3, %v107_v31  ;;  %v42_v31 = vld [vmem:[%s1685_s3 + $0x58] sm:$0xff] }
  0x12   :  { %276 = vmatprep.mubr.bf16.mxu1 %v1326_v50  ;;  %245 = vmatpush1.bf16.msra.mxu1 %v1437_v55 }
  0x13   :  { %246 = vmatprep.subr.bf16.mxu1 %v1439_v56 }
  0x16   :  { %247 = vmatpush1.bf16.msra.mxu1 %v1450_v59 }
  0x17   :  { %469 = vmatprep.subr.bf16.mxu1 %v1426_v51 }
  0xe4   :  { %v160_v33 = vpop.f32.mrb[0].mxu1 }
  0xe5   :  { %v1408_v34 = vadd.f32 %v1126_v32, %v160_v33  ;;  %v1167_v35 = vpop.f32.mrb[1].mxu1  ;;  %v1491_v33 = vpack.c.bf16 %v42_v31, %v40_v30 }
  0xe6   :  { %v163_v36 = vpop.f32.mrb[2].mxu1  ;;  %v41_v35 = vld [vmem:[%s1685_s3 + $0x50] sm:$0xff] }
  0xe7   :  { %v176_v37 = vrot.slane %v1408_v34, %v1399_v24  ;;  %v1412_v38 = vadd.f32 %v1126_v32, %v163_v36  ;;  %v1168_v39 = vpop.f32.mrb[3].mxu1  ;;  %v39_v32 = vld [vmem:[%s1685_s3 + $0x40] sm:$0xff]  ;;  %v44_v36 = vld [vmem:[%s1685_s3 + $0x68] sm:$0xff]  ;;  %358 = vmatprep.subr.bf16.mxu0 %v1491_v33  ;;  %v169_v58 = vcombine.high %v1408_v34, %v1408_v34 }
  0xe8   :  { %v1502_v39 = vpack.c.bf16 %v41_v35, %v39_v32 }
  0xe9   :  { %1189 = vtanh.f32 %v176_v37  ;;  %v1129_v41 = vmul.f32 -1.442695, %v176_v37  ;;  %v184_v2 = vcombine.high %v176_v37, %v176_v37  ;;  %v46_v37 = vld [vmem:[%s1685_s3 + $0x78] sm:$0xff] }
  0xea   :  { %359 = vmatpush1.bf16.msra.mxu0 %v1502_v39 }
  0xeb   :  { %1191 = vpow2.f32 %v1129_v41 }
  0xf3   :  { %v1190_v40 = vpop.eup %1189 }
  0xf4   :  { %226 = vrot.lane.b32.xlu0 %v1190_v40, %s1325_s19  ;;  %v1504_v40 = vpack.c.bf16 %v46_v37, %v44_v36 }
  0xf5   :  { %v1192_v42 = vpop.eup %1191 }
  0xf6   :  { %v221_v43 = vadd.f32 1.0, %v1192_v42  ;;  %360 = vmatprep.subr.bf16.mxu0 %v1504_v40 }
  0xf8   :  { %1193 = vrcp.f32 %v221_v43 }
 0x102   :  { %v1194_v44 = vpop.eup %1193 }
 0x166   :  { %v227_v45 = vpop.permute.xlu0 %226 }
 0x167   :  { %v229_v46 = vmul.f32 %v1194_v44, %v227_v45  ;;  %v45_v45 = vld [vmem:[%s1685_s3 + $0x70] sm:$0xff] }
 0x169   :  { %1195 = vtanh.f32 %v229_v46 }
 0x173   :  { %v1196_v60 = vpop.eup %1195 }
 0x174   :  { %232 = vrot.lane.b32.xlu0 %v1196_v60, %s1327_s11  ;;  %v1542_v60 = vrot.slane %v169_v58, %v1399_v24 }
 0x178   :  { %313 = vrot.lane.b32.xlu0 %v229_v46, %s1328_s12 }
 0x1e6   :  { %v233_v61 = vpop.permute.xlu0 %232 }
 0x1e7   :  { %v235_v62 = vmul.f32 %v1194_v44, %v233_v61  ;;  %v43_v44 = vld [vmem:[%s1685_s3 + $0x60] sm:$0xff] }
 0x1e8   :  { %v1520_v46 = vpack.c.bf16 %v45_v45, %v43_v44 }
 0x1e9   :  { %v236_v63 = vpack.c.bf16 %v235_v62, %v235_v62 }
 0x1ea   :  { %v314_v18 = vpop.permute.xlu0 %313  ;;  %361 = vmatpush1.bf16.msra.mxu0 %v1520_v46 }
 0x1eb   :  { %238 = vrot.lane.b32.xlu1 %v236_v63, %s1328_s12  ;;  %580 = vmatprep.subr.bf16.mxu0 %v1426_v51 }
 0x25d   :  { %v239_v1 = vpop.permute.xlu1 %238 }
 0x25e   :  { %1130 = vmatmul.mubr.msk.bf16.vlgmr.msra.gmra.mrb[4].mxu1 %vm240_vm4, %v239_v1 }
 0x25f   :  { %470 = vmatpush1.bf16.msra.mxu1 %v1437_v55  ;;  %501 = vmatprep.mubr.bf16.mxu1 %v1326_v50 }
 0x260   :  { %471 = vmatprep.subr.bf16.mxu1 %v1439_v56 }
 0x263   :  { %472 = vmatpush1.bf16.msra.mxu1 %v1450_v59 }
 0x264   :  { %473 = vmatprep.subr.bf16.mxu1 %v1491_v33 }
 0x267   :  { %474 = vmatpush1.bf16.msra.mxu1 %v1502_v39 }
 0x268   :  { %475 = vmatprep.subr.bf16.mxu1 %v1504_v40 }
 0x26b   :  { %476 = vmatpush1.bf16.msra.mxu1 %v1520_v46 }
 0x26c   :  { %691 = vmatprep.subr.bf16.mxu1 %v1426_v51 }
 0x331   :  { %v278_v4 = vpop.f32.mrb[4].mxu1 }
 0x332   :  { %v304_v5 = vadd.f32 %v278_v4, %v184_v2  ;;  %v280_v6 = vpop.f32.mrb[5].mxu1 }
 0x333   :  { %v285_v7 = vadd.f32 %v1469_v3, %v280_v6  ;;  %v282_v8 = vpop.f32.mrb[6].mxu1 }
 0x334   :  { %1197 = vtanh.f32 %v304_v5  ;;  %v283_v9 = vpop.f32.mrb[7].mxu1  ;;  %v1132_v12 = vmul.f32 -1.442695, %v304_v5 }
 0x335   :  { %1199 = vtanh.f32 %v285_v7  ;;  %v1131_v13 = vmul.f32 -1.442695, %v285_v7 }
 0x336   :  { %1201 = vpow2.f32 %v1132_v12 }
 0x337   :  { %1203 = vpow2.f32 %v1131_v13 }
 0x33e   :  { %v1198_v10 = vpop.eup %1197 }
 0x33f   :  { %v1200_v11 = vpop.eup %1199  ;;  %318 = vrot.lane.b32.xlu1 %v1198_v10, %s1325_s19 }
 0x340   :  { %294 = vrot.lane.b32.xlu0 %v1200_v11, %s1325_s19  ;;  %v1202_v14 = vpop.eup %1201 }
 0x341   :  { %v1204_v15 = vpop.eup %1203  ;;  %v308_v16 = vadd.f32 1.0, %v1202_v14 }
 0x342   :  { %v289_v17 = vadd.f32 1.0, %v1204_v15 }
 0x343   :  { %1205 = vrcp.f32 %v308_v16 }
 0x344   :  { %1207 = vrcp.f32 %v289_v17 }
 0x34d   :  { %v1206_v19 = vpop.eup %1205 }
 0x34e   :  { %v1208_v21 = vpop.eup %1207  ;;  %v316_v27 = vmul.f32 %v1206_v19, %v314_v18 }
 0x3b1   :  { %v319_v20 = vpop.permute.xlu1 %318 }
 0x3b2   :  { %v321_v22 = vmul.f32 %v1206_v19, %v319_v20  ;;  %v295_v23 = vpop.permute.xlu0 %294 }
 0x3b3   :  { %v1474_v25 = vmul.f32 %v1208_v21, %v295_v23 }
 0x3b4   :  { %323 = vrot.lane.b32.xlu1 %v321_v22, %s1328_s12 }
 0x3b5   :  { %1209 = vtanh.f32 %v1474_v25 }
 0x3bf   :  { %v1210_v26 = vpop.eup %1209 }
 0x3c0   :  { %300 = vrot.lane.b32.xlu0 %v1210_v26, %s1327_s11 }
 0x426   :  { %v324_v28 = vpop.permute.xlu1 %323 }
 0x427   :  { %v1479_v29 = vadd.f32 %v324_v28, %v316_v27 }
 0x429   :  { %1211 = vtanh.f32 %v1479_v29 }
 0x432   :  { %v301_v41 = vpop.permute.xlu0 %300 }
 0x433   :  { %v1212_v42 = vpop.eup %1211  ;;  %v303_v43 = vmul.f32 %v1208_v21, %v301_v41 }
 0x434   :  { %329 = vrot.lane.b32.xlu1 %v1212_v42, %s1325_s19  ;;  %v185_v42 = vcombine.high %v1542_v60, %v1542_v60 }
 0x435   :  { %345 = vrot.lane.b32.xlu0 %v303_v43, %s1325_s19 }
 0x4a6   :  { %v330_v47 = vpop.permute.xlu1 %329 }
 0x4a7   :  { %v332_v48 = vmul.f32 %v1206_v19, %v330_v47  ;;  %v346_v52 = vpop.permute.xlu0 %345 }
 0x4a9   :  { %v340_v49 = vrot.slane %v332_v48, %v1399_v24 }
 0x4ab   :  { %341 = vrot.lane.b32.xlu1 %v340_v49, %s1328_s12 }
 0x51d   :  { %v342_v53 = vpop.permute.xlu1 %341 }
 0x51e   :  { %v348_v54 = vsel %vm240_vm4, %v342_v53, %v346_v52 }
 0x51f   :  { %v349_v57 = vpack.c.bf16 %v348_v54, %v348_v54 }
 0x521   :  { %1133 = vmatmul.mubr.msk.bf16.vlgmr.msra.gmra.mrb[0].mxu0 %vm350_vm5, %v349_v57 }
 0x522   :  { %581 = vmatpush1.bf16.msra.mxu0 %v1437_v55  ;;  %612 = vmatprep.mubr.bf16.mxu0 %v1326_v50 }
 0x523   :  { %582 = vmatprep.subr.bf16.mxu0 %v1439_v56 }
 0x526   :  { %583 = vmatpush1.bf16.msra.mxu0 %v1450_v59 }
 0x527   :  { %584 = vmatprep.subr.bf16.mxu0 %v1491_v33 }
 0x52a   :  { %585 = vmatpush1.bf16.msra.mxu0 %v1502_v39 }
 0x52b   :  { %586 = vmatprep.subr.bf16.mxu0 %v1504_v40 }
 0x52e   :  { %587 = vmatpush1.bf16.msra.mxu0 %v1520_v46 }
 0x52f   :  { %802 = vmatprep.subr.bf16.mxu0 %v1426_v51 }
 0x5f4   :  { %v388_v61 = vpop.f32.mrb[0].mxu0 }
 0x5f5   :  { %v424_v62 = vadd.f32 %v388_v61, %v1542_v60  ;;  %v390_v63 = vpop.f32.mrb[1].mxu0 }
 0x5f6   :  { %v395_v1 = vadd.f32 %v1469_v3, %v390_v63  ;;  %v392_v2 = vpop.f32.mrb[2].mxu0 }
 0x5f7   :  { %1213 = vtanh.f32 %v424_v62  ;;  %v393_v4 = vpop.f32.mrb[3].mxu0  ;;  %v1135_v34 = vmul.f32 -1.442695, %v424_v62 }
 0x5f8   :  { %1215 = vtanh.f32 %v395_v1  ;;  %v1134_v7 = vmul.f32 -1.442695, %v395_v1 }
 0x5f9   :  { %1217 = vpow2.f32 %v1135_v34 }
 0x5fa   :  { %1219 = vpow2.f32 %v1134_v7 }
 0x601   :  { %v1214_v5 = vpop.eup %1213 }
 0x602   :  { %v1216_v6 = vpop.eup %1215  ;;  %434 = vrot.lane.b32.xlu1 %v1214_v5, %s1325_s19 }
 0x603   :  { %409 = vrot.lane.b32.xlu0 %v1216_v6, %s1325_s19  ;;  %v1218_v8 = vpop.eup %1217 }
 0x604   :  { %v1220_v9 = vpop.eup %1219  ;;  %v428_v10 = vadd.f32 1.0, %v1218_v8 }
 0x605   :  { %v399_v11 = vadd.f32 1.0, %v1220_v9 }
 0x606   :  { %404 = vrot.lane.b32.xlu1 %v1474_v25, %s1328_s12  ;;  %1221 = vrcp.f32 %v428_v10 }
 0x607   :  { %1223 = vrcp.f32 %v399_v11 }
 0x610   :  { %v1222_v12 = vpop.eup %1221 }
 0x611   :  { %v1224_v14 = vpop.eup %1223  ;;  %v432_v19 = vmul.f32 %v1222_v12, %v1479_v29 }
 0x674   :  { %v435_v13 = vpop.permute.xlu1 %434 }
 0x675   :  { %v437_v15 = vmul.f32 %v1222_v12, %v435_v13  ;;  %v410_v16 = vpop.permute.xlu0 %409 }
 0x676   :  { %v412_v17 = vmul.f32 %v1224_v14, %v410_v16 }
 0x677   :  { %439 = vrot.lane.b32.xlu0 %v437_v15, %s1328_s12 }
 0x678   :  { %414 = vrot.lane.b32.xlu1 %v412_v17, %s1328_s12  ;;  %v405_v18 = vpop.permute.xlu1 %404 }
 0x679   :  { %v407_v20 = vmul.f32 %v1224_v14, %v405_v18 }
 0x6e9   :  { %v440_v21 = vpop.permute.xlu0 %439 }
 0x6ea   :  { %v442_v22 = vadd.f32 %v440_v21, %v432_v19  ;;  %v415_v23 = vpop.permute.xlu1 %414 }
 0x6eb   :  { %v417_v25 = vadd.f32 %v415_v23, %v407_v20  ;;  %v1594_v23 = vrot.slane %v1412_v38, %v1399_v24 }
 0x6ec   :  { %1225 = vtanh.f32 %v442_v22 }
 0x6ed   :  { %1227 = vtanh.f32 %v417_v25 }
 0x6f6   :  { %v1226_v26 = vpop.eup %1225 }
 0x6f7   :  { %v1228_v27 = vpop.eup %1227  ;;  %445 = vrot.lane.b32.xlu0 %v1226_v26, %s1325_s19 }
 0x6f8   :  { %420 = vrot.lane.b32.xlu1 %v1228_v27, %s1325_s19 }
 0x769   :  { %v446_v28 = vpop.permute.xlu0 %445 }
 0x76a   :  { %v448_v30 = vmul.f32 %v1222_v12, %v446_v28  ;;  %v421_v31 = vpop.permute.xlu1 %420 }
 0x76b   :  { %v423_v32 = vmul.f32 %v1224_v14, %v421_v31 }
 0x76c   :  { %v456_v35 = vrot.slane %v448_v30, %v1399_v24 }
 0x76d   :  { %461 = vrot.lane.b32.xlu1 %v423_v32, %s1325_s19 }
 0x76e   :  { %457 = vrot.lane.b32.xlu0 %v456_v35, %s1328_s12 }
 0x7df   :  { %v462_v29 = vpop.permute.xlu1 %461 }
 0x7e0   :  { %v458_v36 = vpop.permute.xlu0 %457 }
 0x7e1   :  { %v464_v37 = vsel %vm240_vm4, %v458_v36, %v462_v29 }
 0x7e2   :  { %v465_v41 = vpack.c.bf16 %v464_v37, %v464_v37 }
 0x7e4   :  { %1136 = vmatmul.mubr.msk.bf16.vlgmr.msra.gmra.mrb[8].mxu1 %vm350_vm5, %v465_v41 }
 0x7e5   :  { %692 = vmatpush1.bf16.msra.mxu1 %v1437_v55  ;;  %723 = vmatprep.mubr.bf16.mxu1 %v1326_v50 }
 0x7e6   :  { %693 = vmatprep.subr.bf16.mxu1 %v1439_v56 }
 0x7e9   :  { %694 = vmatpush1.bf16.msra.mxu1 %v1450_v59 }
 0x7ea   :  { %695 = vmatprep.subr.bf16.mxu1 %v1491_v33 }
 0x7ed   :  { %696 = vmatpush1.bf16.msra.mxu1 %v1502_v39 }
 0x7ee   :  { %697 = vmatprep.subr.bf16.mxu1 %v1504_v40 }
 0x7f1   :  { %698 = vmatpush1.bf16.msra.mxu1 %v1520_v46 }
 0x7f2   :  { %913 = vmatprep.subr.bf16.mxu1 %v1426_v51 }
 0x8b7   :  { %v503_v43 = vpop.f32.mrb[8].mxu1 }
 0x8b8   :  { %v535_v44 = vadd.f32 %v503_v43, %v185_v42  ;;  %v505_v45 = vpop.f32.mrb[9].mxu1 }
 0x8b9   :  { %v510_v47 = vadd.f32 %v1469_v3, %v505_v45  ;;  %v507_v48 = vpop.f32.mrb[10].mxu1 }
 0x8ba   :  { %1229 = vtanh.f32 %v535_v44  ;;  %v508_v49 = vpop.f32.mrb[11].mxu1  ;;  %v1138_v54 = vmul.f32 -1.442695, %v535_v44 }
 0x8bb   :  { %1231 = vtanh.f32 %v510_v47  ;;  %v1137_v57 = vmul.f32 -1.442695, %v510_v47 }
 0x8bc   :  { %1233 = vpow2.f32 %v1138_v54 }
 0x8bd   :  { %1235 = vpow2.f32 %v1137_v57 }
 0x8c4   :  { %v1230_v52 = vpop.eup %1229 }
 0x8c5   :  { %v1232_v53 = vpop.eup %1231  ;;  %545 = vrot.lane.b32.xlu0 %v1230_v52, %s1325_s19 }
 0x8c6   :  { %520 = vrot.lane.b32.xlu1 %v1232_v53, %s1325_s19  ;;  %v1234_v58 = vpop.eup %1233 }
 0x8c7   :  { %v1236_v60 = vpop.eup %1235  ;;  %v539_v61 = vadd.f32 1.0, %v1234_v58 }
 0x8c8   :  { %v514_v62 = vadd.f32 1.0, %v1236_v60 }
 0x8c9   :  { %1237 = vrcp.f32 %v539_v61 }
 0x8ca   :  { %1239 = vrcp.f32 %v514_v62 }
 0x8d3   :  { %v1238_v63 = vpop.eup %1237 }
 0x8d4   :  { %v1240_v2 = vpop.eup %1239  ;;  %v543_v34 = vmul.f32 %v1238_v63, %v442_v22 }
 0x8d5   :  { %v518_v8 = vmul.f32 %v1240_v2, %v417_v25 }
 0x937   :  { %v546_v1 = vpop.permute.xlu0 %545 }
 0x938   :  { %v548_v4 = vmul.f32 %v1238_v63, %v546_v1  ;;  %v521_v5 = vpop.permute.xlu1 %520 }
 0x939   :  { %v523_v6 = vmul.f32 %v1240_v2, %v521_v5 }
 0x93a   :  { %550 = vrot.lane.b32.xlu0 %v548_v4, %s1328_s12 }
 0x93b   :  { %525 = vrot.lane.b32.xlu1 %v523_v6, %s1328_s12 }
 0x9ac   :  { %v551_v7 = vpop.permute.xlu0 %550 }
 0x9ad   :  { %v553_v9 = vadd.f32 %v551_v7, %v543_v34  ;;  %v526_v10 = vpop.permute.xlu1 %525 }
 0x9ae   :  { %v528_v11 = vadd.f32 %v526_v10, %v518_v8  ;;  %v201_v10 = vcombine.high %v1594_v23, %v1594_v23 }
 0x9af   :  { %1241 = vtanh.f32 %v553_v9 }
 0x9b0   :  { %1243 = vtanh.f32 %v528_v11 }
 0x9b9   :  { %v1242_v12 = vpop.eup %1241 }
 0x9ba   :  { %v1244_v13 = vpop.eup %1243  ;;  %556 = vrot.lane.b32.xlu0 %v1242_v12, %s1325_s19 }
 0x9bb   :  { %531 = vrot.lane.b32.xlu1 %v1244_v13, %s1325_s19 }
 0xa2c   :  { %v557_v14 = vpop.permute.xlu0 %556 }
 0xa2d   :  { %v559_v15 = vmul.f32 %v1238_v63, %v557_v14  ;;  %v532_v16 = vpop.permute.xlu1 %531 }
 0xa2e   :  { %v534_v17 = vmul.f32 %v1240_v2, %v532_v16 }
 0xa2f   :  { %v567_v18 = vrot.slane %v559_v15, %v1399_v24 }
 0xa30   :  { %572 = vrot.lane.b32.xlu1 %v534_v17, %s1325_s19 }
 0xa31   :  { %568 = vrot.lane.b32.xlu0 %v567_v18, %s1328_s12 }
 0xaa2   :  { %v573_v19 = vpop.permute.xlu1 %572 }
 0xaa3   :  { %v569_v20 = vpop.permute.xlu0 %568 }
 0xaa4   :  { %v575_v21 = vsel %vm240_vm4, %v569_v20, %v573_v19 }
 0xaa5   :  { %v576_v22 = vpack.c.bf16 %v575_v21, %v575_v21 }
 0xaa7   :  { %1139 = vmatmul.mubr.msk.bf16.vlgmr.msra.gmra.mrb[4].mxu0 %vm350_vm5, %v576_v22 }
 0xaa8   :  { %803 = vmatpush1.bf16.msra.mxu0 %v1437_v55  ;;  %834 = vmatprep.mubr.bf16.mxu0 %v1326_v50 }
 0xaa9   :  { %804 = vmatprep.subr.bf16.mxu0 %v1439_v56 }
 0xaac   :  { %805 = vmatpush1.bf16.msra.mxu0 %v1450_v59 }
 0xaad   :  { %806 = vmatprep.subr.bf16.mxu0 %v1491_v33 }
 0xab0   :  { %807 = vmatpush1.bf16.msra.mxu0 %v1502_v39 }
 0xab1   :  { %808 = vmatprep.subr.bf16.mxu0 %v1504_v40 }
 0xab4   :  { %809 = vmatpush1.bf16.msra.mxu0 %v1520_v46 }
 0xab5   :  { %1169 = vmatprep.subr.bf16.mxu0 %v1321_v0 }
 0xb7a   :  { %v614_v25 = vpop.f32.mrb[4].mxu0 }
 0xb7b   :  { %v646_v26 = vadd.f32 %v614_v25, %v1594_v23  ;;  %v616_v27 = vpop.f32.mrb[5].mxu0 }
 0xb7c   :  { %v621_v28 = vadd.f32 %v1469_v3, %v616_v27  ;;  %v618_v30 = vpop.f32.mrb[6].mxu0 }
 0xb7d   :  { %1245 = vtanh.f32 %v646_v26  ;;  %v619_v31 = vpop.f32.mrb[7].mxu0  ;;  %v1141_v29 = vmul.f32 -1.442695, %v646_v26 }
 0xb7e   :  { %1247 = vtanh.f32 %v621_v28  ;;  %v1140_v36 = vmul.f32 -1.442695, %v621_v28 }
 0xb7f   :  { %1249 = vpow2.f32 %v1141_v29 }
 0xb80   :  { %1251 = vpow2.f32 %v1140_v36 }
 0xb87   :  { %v1246_v32 = vpop.eup %1245 }
 0xb88   :  { %v1248_v35 = vpop.eup %1247  ;;  %656 = vrot.lane.b32.xlu0 %v1246_v32, %s1325_s19 }
 0xb89   :  { %631 = vrot.lane.b32.xlu1 %v1248_v35, %s1325_s19  ;;  %v1250_v37 = vpop.eup %1249 }
 0xb8a   :  { %v1252_v41 = vpop.eup %1251  ;;  %v650_v42 = vadd.f32 1.0, %v1250_v37 }
 0xb8b   :  { %v625_v43 = vadd.f32 1.0, %v1252_v41 }
 0xb8c   :  { %1253 = vrcp.f32 %v650_v42 }
 0xb8d   :  { %1255 = vrcp.f32 %v625_v43 }
 0xb96   :  { %v1254_v44 = vpop.eup %1253 }
 0xb97   :  { %v1256_v47 = vpop.eup %1255  ;;  %v654_v53 = vmul.f32 %v1254_v44, %v553_v9 }
 0xb98   :  { %v629_v57 = vmul.f32 %v1256_v47, %v528_v11 }
 0xbfa   :  { %v657_v45 = vpop.permute.xlu0 %656 }
 0xbfb   :  { %v659_v48 = vmul.f32 %v1254_v44, %v657_v45  ;;  %v632_v49 = vpop.permute.xlu1 %631 }
 0xbfc   :  { %v634_v52 = vmul.f32 %v1256_v47, %v632_v49 }
 0xbfd   :  { %661 = vrot.lane.b32.xlu0 %v659_v48, %s1328_s12 }
 0xbfe   :  { %636 = vrot.lane.b32.xlu1 %v634_v52, %s1328_s12  ;;  %v186_v52 = vcombine.high %v1412_v38, %v1412_v38 }
 0xc6f   :  { %v662_v54 = vpop.permute.xlu0 %661 }
 0xc70   :  { %v664_v58 = vadd.f32 %v662_v54, %v654_v53  ;;  %v637_v60 = vpop.permute.xlu1 %636 }
 0xc71   :  { %v639_v61 = vadd.f32 %v637_v60, %v629_v57 }
 0xc72   :  { %1257 = vtanh.f32 %v664_v58 }
 0xc73   :  { %1259 = vtanh.f32 %v639_v61 }
 0xc7c   :  { %v1258_v62 = vpop.eup %1257 }
 0xc7d   :  { %v1260_v63 = vpop.eup %1259  ;;  %667 = vrot.lane.b32.xlu0 %v1258_v62, %s1325_s19 }
 0xc7e   :  { %642 = vrot.lane.b32.xlu1 %v1260_v63, %s1325_s19 }
 0xcef   :  { %v668_v1 = vpop.permute.xlu0 %667 }
 0xcf0   :  { %v670_v2 = vmul.f32 %v1254_v44, %v668_v1  ;;  %v643_v4 = vpop.permute.xlu1 %642 }
 0xcf1   :  { %v645_v5 = vmul.f32 %v1256_v47, %v643_v4 }
 0xcf2   :  { %v678_v6 = vrot.slane %v670_v2, %v1399_v24 }
 0xcf3   :  { %683 = vrot.lane.b32.xlu1 %v645_v5, %s1325_s19 }
 0xcf4   :  { %679 = vrot.lane.b32.xlu0 %v678_v6, %s1328_s12 }
 0xd65   :  { %v684_v34 = vpop.permute.xlu1 %683 }
 0xd66   :  { %v680_v7 = vpop.permute.xlu0 %679 }
 0xd67   :  { %v686_v8 = vsel %vm240_vm4, %v680_v7, %v684_v34 }
 0xd68   :  { %v687_v9 = vpack.c.bf16 %v686_v8, %v686_v8 }
 0xd6a   :  { %1142 = vmatmul.mubr.msk.bf16.vlgmr.msra.gmra.mrb[12].mxu1 %vm350_vm5, %v687_v9 }
 0xd6b   :  { %914 = vmatpush1.bf16.msra.mxu1 %v1437_v55  ;;  %945 = vmatprep.mubr.bf16.mxu1 %v1326_v50 }
 0xd6c   :  { %915 = vmatprep.subr.bf16.mxu1 %v1439_v56 }
 0xd6f   :  { %916 = vmatpush1.bf16.msra.mxu1 %v1450_v59 }
 0xd70   :  { %917 = vmatprep.subr.bf16.mxu1 %v1491_v33 }
 0xd73   :  { %918 = vmatpush1.bf16.msra.mxu1 %v1502_v39 }
 0xd74   :  { %919 = vmatprep.subr.bf16.mxu1 %v1504_v40 }
 0xd77   :  { %920 = vmatpush1.bf16.msra.mxu1 %v1520_v46 }
 0xe3d   :  { %v725_v11 = vpop.f32.mrb[12].mxu1 }
 0xe3e   :  { %v757_v12 = vadd.f32 %v725_v11, %v201_v10  ;;  %v727_v55 = vpop.f32.mrb[13].mxu1 }
 0xe3f   :  { %v732_v50 = vadd.f32 %v1469_v3, %v727_v55  ;;  %v729_v13 = vpop.f32.mrb[14].mxu1 }
 0xe40   :  { %1261 = vtanh.f32 %v757_v12  ;;  %v730_v14 = vpop.f32.mrb[15].mxu1  ;;  %v1144_v39 = vmul.f32 -1.442695, %v757_v12 }
 0xe41   :  { %1263 = vtanh.f32 %v732_v50  ;;  %v1143_v46 = vmul.f32 -1.442695, %v732_v50 }
 0xe42   :  { %1265 = vpow2.f32 %v1144_v39 }
 0xe43   :  { %1267 = vpow2.f32 %v1143_v46 }
 0xe4a   :  { %v1262_v59 = vpop.eup %1261 }
 0xe4b   :  { %v1264_v15 = vpop.eup %1263  ;;  %767 = vrot.lane.b32.xlu0 %v1262_v59, %s1325_s19 }
 0xe4c   :  { %742 = vrot.lane.b32.xlu1 %v1264_v15, %s1325_s19  ;;  %v1266_v16 = vpop.eup %1265 }
 0xe4d   :  { %v1268_v17 = vpop.eup %1267  ;;  %v761_v18 = vadd.f32 1.0, %v1266_v16 }
 0xe4e   :  { %v736_v19 = vadd.f32 1.0, %v1268_v17 }
 0xe4f   :  { %1269 = vrcp.f32 %v761_v18 }
 0xe50   :  { %1271 = vrcp.f32 %v736_v19 }
 0xe59   :  { %v1270_v20 = vpop.eup %1269 }
 0xe5a   :  { %v1272_v22 = vpop.eup %1271  ;;  %v765_v27 = vmul.f32 %v1270_v20, %v664_v58 }
 0xe5b   :  { %v740_v30 = vmul.f32 %v1272_v22, %v639_v61 }
 0xebd   :  { %v768_v21 = vpop.permute.xlu0 %767 }
 0xebe   :  { %v770_v23 = vmul.f32 %v1270_v20, %v768_v21  ;;  %v743_v25 = vpop.permute.xlu1 %742 }
 0xebf   :  { %v745_v26 = vmul.f32 %v1272_v22, %v743_v25 }
 0xec0   :  { %772 = vrot.lane.b32.xlu0 %v770_v23, %s1328_s12 }
 0xec1   :  { %747 = vrot.lane.b32.xlu1 %v745_v26, %s1328_s12 }
 0xf32   :  { %v773_v28 = vpop.permute.xlu0 %772 }
 0xf33   :  { %v775_v31 = vadd.f32 %v773_v28, %v765_v27  ;;  %v748_v32 = vpop.permute.xlu1 %747 }
 0xf34   :  { %v750_v35 = vadd.f32 %v748_v32, %v740_v30 }
 0xf35   :  { %1273 = vtanh.f32 %v775_v31 }
 0xf36   :  { %1275 = vtanh.f32 %v750_v35 }
 0xf3f   :  { %v1274_v29 = vpop.eup %1273 }
 0xf40   :  { %v1276_v36 = vpop.eup %1275  ;;  %778 = vrot.lane.b32.xlu0 %v1274_v29, %s1325_s19 }
 0xf41   :  { %753 = vrot.lane.b32.xlu1 %v1276_v36, %s1325_s19 }
 0xfb2   :  { %v779_v37 = vpop.permute.xlu0 %778 }
 0xfb3   :  { %v781_v41 = vmul.f32 %v1270_v20, %v779_v37  ;;  %v754_v42 = vpop.permute.xlu1 %753 }
 0xfb4   :  { %v756_v43 = vmul.f32 %v1272_v22, %v754_v42 }
 0xfb5   :  { %v789_v44 = vrot.slane %v781_v41, %v1399_v24 }
 0xfb6   :  { %794 = vrot.lane.b32.xlu1 %v756_v43, %s1325_s19 }
 0xfb7   :  { %790 = vrot.lane.b32.xlu0 %v789_v44, %s1328_s12 }
0x1028   :  { %v795_v45 = vpop.permute.xlu1 %794 }
0x1029   :  { %v791_v47 = vpop.permute.xlu0 %790 }
0x102a   :  { %v797_v48 = vsel %vm240_vm4, %v791_v47, %v795_v45 }
0x102b   :  { %v798_v49 = vpack.c.bf16 %v797_v48, %v797_v48 }
0x102d   :  { %1145 = vmatmul.mubr.msk.bf16.vlgmr.msra.gmra.mrb[8].mxu0 %vm350_vm5, %v798_v49 }
0x102e   :  { %1170 = vmatpush3.bf16.msra.mxu0 %v1426_v51  ;;  %1177 = vmatprep.mubr.msk.bf16.mxu0 %vm1323_vm2, %v1321_v0  ;;  %v200_v51 = vrot.slane %v186_v52, %v1399_v24 }
0x102f   :  { %1171 = vmatprep.subr.bf16.mxu0 %v1321_v0 }
0x1030   :  { %v202_v20 = vcombine.high %v200_v51, %v200_v51 }
0x1032   :  { %1172 = vmatpush3.bf16.msra.mxu0 %v1439_v56 }
0x1033   :  { %1173 = vmatprep.subr.bf16.mxu0 %v1321_v0 }
0x1036   :  { %1174 = vmatpush3.bf16.msra.mxu0 %v1491_v33 }
0x1037   :  { %1175 = vmatprep.subr.bf16.mxu0 %v1321_v0 }
0x103a   :  { %1176 = vmatpush3.bf16.msra.mxu0 %v1504_v40 }
0x1100   :  { %v836_v53 = vpop.f32.mrb[8].mxu0 }
0x1101   :  { %v868_v54 = vadd.f32 %v836_v53, %v200_v51  ;;  %v838_v57 = vpop.f32.mrb[9].mxu0 }
0x1102   :  { %v843_v58 = vadd.f32 %v1469_v3, %v838_v57  ;;  %v840_v60 = vpop.f32.mrb[10].mxu0 }
0x1103   :  { %1277 = vtanh.f32 %v868_v54  ;;  %v841_v56 = vpop.f32.mrb[11].mxu0  ;;  %v1147_v0 = vmul.f32 -1.442695, %v868_v54 }
0x1104   :  { %1279 = vtanh.f32 %v843_v58  ;;  %v1146_v40 = vmul.f32 -1.442695, %v843_v58 }
0x1105   :  { %1281 = vpow2.f32 %v1147_v0 }
0x1106   :  { %1283 = vpow2.f32 %v1146_v40 }
0x110d   :  { %v1278_v61 = vpop.eup %1277 }
0x110e   :  { %v1280_v33 = vpop.eup %1279  ;;  %878 = vrot.lane.b32.xlu0 %v1278_v61, %s1325_s19 }
0x110f   :  { %853 = vrot.lane.b32.xlu1 %v1280_v33, %s1325_s19  ;;  %v1282_v38 = vpop.eup %1281 }
0x1110   :  { %v1284_v62 = vpop.eup %1283  ;;  %v872_v63 = vadd.f32 1.0, %v1282_v38 }
0x1111   :  { %v847_v1 = vadd.f32 1.0, %v1284_v62 }
0x1112   :  { %1285 = vrcp.f32 %v872_v63 }
0x1113   :  { %1287 = vrcp.f32 %v847_v1 }
0x111c   :  { %v1286_v2 = vpop.eup %1285 }
0x111d   :  { %v1288_v5 = vpop.eup %1287  ;;  %v876_v8 = vmul.f32 %v1286_v2, %v775_v31 }
0x111e   :  { %v851_v10 = vmul.f32 %v1288_v5, %v750_v35 }
0x1180   :  { %v879_v4 = vpop.permute.xlu0 %878 }
0x1181   :  { %v881_v6 = vmul.f32 %v1286_v2, %v879_v4  ;;  %v854_v34 = vpop.permute.xlu1 %853 }
0x1182   :  { %v856_v7 = vmul.f32 %v1288_v5, %v854_v34 }
0x1183   :  { %883 = vrot.lane.b32.xlu0 %v881_v6, %s1328_s12 }
0x1184   :  { %858 = vrot.lane.b32.xlu1 %v856_v7, %s1328_s12 }
0x11f5   :  { %v884_v9 = vpop.permute.xlu0 %883 }
0x11f6   :  { %v886_v11 = vadd.f32 %v884_v9, %v876_v8  ;;  %v859_v12 = vpop.permute.xlu1 %858 }
0x11f7   :  { %v861_v55 = vadd.f32 %v859_v12, %v851_v10 }
0x11f8   :  { %1289 = vtanh.f32 %v886_v11 }
0x11f9   :  { %1291 = vtanh.f32 %v861_v55 }
0x1202   :  { %v1290_v50 = vpop.eup %1289 }
0x1203   :  { %v1292_v13 = vpop.eup %1291  ;;  %889 = vrot.lane.b32.xlu0 %v1290_v50, %s1325_s19 }
0x1204   :  { %864 = vrot.lane.b32.xlu1 %v1292_v13, %s1325_s19 }
0x1275   :  { %v890_v14 = vpop.permute.xlu0 %889 }
0x1276   :  { %v892_v59 = vmul.f32 %v1286_v2, %v890_v14  ;;  %v865_v15 = vpop.permute.xlu1 %864  ;;  %v12_v14 = vstv %s1688_s6 }
0x1277   :  { %v867_v39 = vmul.f32 %v1288_v5, %v865_v15  ;;  %13 = vst [vmem:[#allocation2] sm:$0x1] %v12_v14 }
0x1278   :  { %v900_v46 = vrot.slane %v892_v59, %v1399_v24 }
0x1279   :  { %905 = vrot.lane.b32.xlu1 %v867_v39, %s1325_s19 }
0x127a   :  { %901 = vrot.lane.b32.xlu0 %v900_v46, %s1328_s12 }
0x12eb   :  { %v906_v16 = vpop.permute.xlu1 %905 }
0x12ec   :  { %v902_v17 = vpop.permute.xlu0 %901 }
0x12ed   :  { %v908_v18 = vsel %vm240_vm4, %v902_v17, %v906_v16 }
0x12ee   :  { %v909_v19 = vpack.c.bf16 %v908_v18, %v908_v18  ;;  %v1154_v18 = vld [vmem:[#allocation2] ss:$0 sm:$0xff] }
0x12f0   :  { %1148 = vmatmul.mubr.msk.bf16.vlgmr.msra.gmra.mrb[16].mxu1 %vm350_vm5, %v909_v19 }
0x13c3   :  { %v947_v21 = vpop.f32.mrb[16].mxu1 }
0x13c4   :  { %v979_v22 = vadd.f32 %v947_v21, %v202_v20  ;;  %v949_v23 = vpop.f32.mrb[17].mxu1 }
0x13c5   :  { %v954_v25 = vadd.f32 %v1469_v3, %v949_v23  ;;  %v951_v26 = vpop.f32.mrb[18].mxu1 }
0x13c6   :  { %1293 = vtanh.f32 %v979_v22  ;;  %v952_v27 = vpop.f32.mrb[19].mxu1  ;;  %v1150_v31 = vmul.f32 -1.442695, %v979_v22 }
0x13c7   :  { %1295 = vtanh.f32 %v954_v25  ;;  %v1149_v32 = vmul.f32 -1.442695, %v954_v25 }
0x13c8   :  { %1297 = vpow2.f32 %v1150_v31 }
0x13c9   :  { %1299 = vpow2.f32 %v1149_v32 }
0x13d0   :  { %v1294_v28 = vpop.eup %1293 }
0x13d1   :  { %v1296_v30 = vpop.eup %1295  ;;  %989 = vrot.lane.b32.xlu0 %v1294_v28, %s1325_s19 }
0x13d2   :  { %964 = vrot.lane.b32.xlu1 %v1296_v30, %s1325_s19  ;;  %v1298_v35 = vpop.eup %1297 }
0x13d3   :  { %v1300_v29 = vpop.eup %1299  ;;  %v983_v36 = vadd.f32 1.0, %v1298_v35 }
0x13d4   :  { %v958_v37 = vadd.f32 1.0, %v1300_v29 }
0x13d5   :  { %1301 = vrcp.f32 %v983_v36 }
0x13d6   :  { %1303 = vrcp.f32 %v958_v37 }
0x13df   :  { %v1302_v41 = vpop.eup %1301 }
0x13e0   :  { %v1304_v43 = vpop.eup %1303  ;;  %v987_v48 = vmul.f32 %v1302_v41, %v886_v11 }
0x13e1   :  { %v962_v52 = vmul.f32 %v1304_v43, %v861_v55 }
0x1443   :  { %v990_v42 = vpop.permute.xlu0 %989 }
0x1444   :  { %v992_v44 = vmul.f32 %v1302_v41, %v990_v42  ;;  %v965_v45 = vpop.permute.xlu1 %964 }
0x1445   :  { %v967_v47 = vmul.f32 %v1304_v43, %v965_v45 }
0x1446   :  { %994 = vrot.lane.b32.xlu0 %v992_v44, %s1328_s12 }
0x1447   :  { %969 = vrot.lane.b32.xlu1 %v967_v47, %s1328_s12 }
0x14b8   :  { %v995_v49 = vpop.permute.xlu0 %994 }
0x14b9   :  { %v997_v51 = vadd.f32 %v995_v49, %v987_v48  ;;  %v970_v53 = vpop.permute.xlu1 %969 }
0x14ba   :  { %v972_v54 = vadd.f32 %v970_v53, %v962_v52 }
0x14bb   :  { %1305 = vtanh.f32 %v997_v51 }
0x14bc   :  { %1307 = vtanh.f32 %v972_v54 }
0x14c5   :  { %v1306_v57 = vpop.eup %1305 }
0x14c6   :  { %v1308_v58 = vpop.eup %1307  ;;  %1000 = vrot.lane.b32.xlu0 %v1306_v57, %s1325_s19 }
0x14c7   :  { %975 = vrot.lane.b32.xlu1 %v1308_v58, %s1325_s19 }
0x1538   :  { %v1001_v60 = vpop.permute.xlu0 %1000 }
0x1539   :  { %v1003_v56 = vmul.f32 %v1302_v41, %v1001_v60  ;;  %v976_v61 = vpop.permute.xlu1 %975 }
0x153a   :  { %v978_v33 = vmul.f32 %v1304_v43, %v976_v61 }
0x153b   :  { %v1011_v0 = vrot.slane %v1003_v56, %v1399_v24 }
0x153c   :  { %1016 = vrot.lane.b32.xlu1 %v978_v33, %s1325_s19 }
0x153d   :  { %1012 = vrot.lane.b32.xlu0 %v1011_v0, %s1328_s12 }
0x15ae   :  { %v1017_v40 = vpop.permute.xlu1 %1016 }
0x15af   :  { %v1013_v38 = vpop.permute.xlu0 %1012 }
0x15b0   :  { %v1019_v62 = vsel %vm240_vm4, %v1013_v38, %v1017_v40 }
0x15b1   :  { %v1020_v63 = vpack.c.bf16 %v1019_v62, %v1019_v62 }
0x15b3   :  { %1178 = vmatmul.mubr.msk.bf16.vlgmr.msra.gmra.mrb[12].mxu0 %vm350_vm5, %v1020_v63 }
0x1686   :  { %v1058_v1 = vpop.f32.mrb[12].mxu0 }
0x1687   :  { %v1059_v2 = vadd.f32 %v1469_v3, %v1058_v1  ;;  %v1179_v4 = vpop.f32.mrb[13].mxu0  ;;  %v1153_v3 = vld [vmem:[%s1687_s5] ss:$0 sm:$0xff] }
0x1688   :  { %v1061_v5 = vpop.f32.mrb[14].mxu0 }
0x1689   :  { %1309 = vtanh.f32 %v1059_v2  ;;  %v1180_v6 = vpop.f32.mrb[15].mxu0  ;;  %v1152_v24 = vmul.f32 -1.442695, %v1059_v2 }
0x168b   :  { %1311 = vpow2.f32 %v1152_v24 }
0x1693   :  { %v1310_v34 = vpop.eup %1309 }
0x1694   :  { %1073 = vrot.lane.b32.xlu0 %v1310_v34, %s1325_s19 }
0x1695   :  { %v1312_v7 = vpop.eup %1311 }
0x1696   :  { %v1067_v8 = vadd.f32 1.0, %v1312_v7 }
0x1698   :  { %1313 = vrcp.f32 %v1067_v8 }
0x16a2   :  { %v1314_v9 = vpop.eup %1313 }
0x16a3   :  { %v1071_v12 = vmul.f32 %v1314_v9, %v972_v54 }
0x1706   :  { %v1074_v10 = vpop.permute.xlu0 %1073 }
0x1707   :  { %v1076_v11 = vmul.f32 %v1314_v9, %v1074_v10 }
0x1709   :  { %1078 = vrot.lane.b32.xlu1 %v1076_v11, %s1328_s12 }
0x170d   :  { %1094 = vrot.lane.b32.xlu1 %v1153_v3, %s1327_s11 }
0x177b   :  { %v1079_v55 = vpop.permute.xlu1 %1078 }
0x177c   :  { %v1081_v50 = vadd.f32 %v1079_v55, %v1071_v12 }
0x177e   :  { %1315 = vtanh.f32 %v1081_v50 }
0x177f   :  { %v1095_v15 = vpop.permute.xlu1 %1094 }
0x1788   :  { %v1316_v13 = vpop.eup %1315 }
0x1789   :  { %1084 = vrot.lane.b32.xlu0 %v1316_v13, %s1325_s19 }
0x17fb   :  { %v1085_v59 = vpop.permute.xlu0 %1084 }
0x17fc   :  { %v1087_v39 = vmul.f32 %v1314_v9, %v1085_v59 }
0x17fe   :  { %v1097_v46 = vmul.f32 %v1095_v15, %v1087_v39 }
0x1800   :  { %1099 = vrot.lane.b32.xlu0 %v1097_v46, %s1328_s12 }
0x1872   :  { %v1100_v16 = vpop.permute.xlu0 %1099 }
0x1873   :  { %v1103_v17 = vsel %vm1102_vm6, %v1100_v16, 0.0 }
0x1874   :  { %1104 = vadd.xlane.f32.xlu1 %v1103_v17 }
0x1901   :  { %v1105_v19 = vpop.xlane.xlu1 %1104 }
0x1902   :  { %v1113_v20 = vadd.f32 %v1154_v18, %v1105_v19 }
0x1904   :  { %v1155_v21 = vmul.f32 -1.442695, %v1113_v20 }
0x1906   :  { %1317 = vpow2.f32 %v1155_v21 }
0x1910   :  { %v1318_v22 = vpop.eup %1317 }
0x1911   :  { %v1117_v23 = vadd.f32 1.0, %v1318_v22 }
0x1913   :  { %1319 = vrcp.f32 %v1117_v23 }
0x191d   :  { %v1320_v25 = vpop.eup %1319 }
0x191e   :  { %1121 = vst.msk [vmem:[%s1689_s7] sm:$0x3] %vm1120_vm7, %v1320_v25 }

</bundles_post_ra>
